<compile_context>
chip_gen: v7x
topology: tpu7x:2x2x1
jax: 0.10.0
libtpu: 0.0.40
codegen_flags: <defaults>
</compile_context>

<pallas_src>
import functools
import math

import jax
import jax.numpy as jnp
from jax.experimental import pallas as pl
from jax.experimental.pallas import tpu as pltpu


def _round_up(x, m):
    return ((x + m - 1) // m) * m


def _layer_norm(x, w, b, eps=1e-5):
    mu = jnp.mean(x, axis=-1, keepdims=True)
    var = jnp.mean((x - mu) ** 2, axis=-1, keepdims=True)
    return (x - mu) * jax.lax.rsqrt(var + eps) * w + b


# ----------------------------- fused Pallas kernel ---------------------------


def _vit_fused_kernel(patch_ref, pw_ref, pb_ref, cls_ref, pos_ref,
                      ln1w_ref, ln1b_ref, wqkv_ref, bqkv_ref, wo_ref, bo_ref,
                      w1_ref, b1_ref, w2_ref, b2_ref,
                      clsw_ref, clsb_ref,
                      hid_ref, logit_ref,
                      *, num_layers, num_heads, head_dim, hidden_dim,
                      seq_real, seq_pad):
    """One batch element: embed -> L encoder layers -> head. All data stays in VMEM."""
    num_patch = seq_real - 1
    H = hidden_dim

    # ------------------------------ embedding --------------------------------
    proj = jnp.dot(patch_ref[...].astype(jnp.bfloat16), pw_ref[...],
                   preferred_element_type=jnp.float32) + pb_ref[...]        # (P, H) f32
    hid_ref[0:num_patch, :] = proj + pos_ref[0:num_patch, :]
    # CLS token appended at the END (matches torch.cat([x, cls], 1)).
    hid_ref[num_patch:seq_real, :] = cls_ref[...] + pos_ref[num_patch:seq_real, :]
    if seq_pad > seq_real:
        hid_ref[seq_real:, :] = jnp.zeros((seq_pad - seq_real, H), jnp.float32)
    # TODO(synk): embedding Dropout(p=0.1) skipped — eval-mode semantics.

    x = hid_ref[...]                                                        # (S_pad, H)

    # Key-padding bias: pad key columns get -inf-ish scores; pad rows never feed real rows.
    if seq_pad > seq_real:
        col = jax.lax.broadcasted_iota(jnp.int32, (1, seq_pad), 1)
        key_bias = jnp.where(col < seq_real, 0.0, -1e30).astype(jnp.float32)
    else:
        key_bias = None

    # ---------------------------- encoder layers -----------------------------
    for l in range(num_layers):
        xn = _layer_norm(x, ln1w_ref[l], ln1b_ref[l])
        # 1/sqrt(head_dim) already folded into the Q block of wqkv / bqkv at init.
        qkv = jnp.dot(xn.astype(jnp.bfloat16), wqkv_ref[l],
                      preferred_element_type=jnp.float32) + bqkv_ref[l]     # (S_pad, 3H)

        wo = wo_ref[l]
        acc = jnp.zeros((seq_pad, H), jnp.float32)
        for h in range(num_heads):
            lo, hi = h * head_dim, (h + 1) * head_dim
            q = qkv[:, lo:hi]
            k = qkv[:, H + lo:H + hi]
            v = qkv[:, 2 * H + lo:2 * H + hi]
            # q @ k^T without materializing a transpose: contract the last dims.
            s = jax.lax.dot_general(q.astype(jnp.bfloat16), k.astype(jnp.bfloat16),
                                    dimension_numbers=(((1,), (1,)), ((), ())),
                                    preferred_element_type=jnp.float32)     # (S_pad, S_pad)
            if key_bias is not None:
                s = s + key_bias
            s = s - jnp.max(s, axis=-1, keepdims=True)
            p = jnp.exp(s)
            p = p * pl.reciprocal(jnp.sum(p, axis=-1, keepdims=True), approx=True)
            # TODO(synk): attention-prob dropout (p=0.1) skipped — eval-mode semantics.
            ctx = jnp.dot(p.astype(jnp.bfloat16), v.astype(jnp.bfloat16),
                          preferred_element_type=jnp.float32)               # (S_pad, hd)
            # Fold the per-head slice of the output projection here (no concat of heads).
            acc = acc + jnp.dot(ctx.astype(jnp.bfloat16), wo[lo:hi, :],
                                preferred_element_type=jnp.float32)
        x1 = acc + bo_ref[l] + x                                            # residual 1

        # Reference feeds x1 (NOT layer_norm2(x1)) into the MLP; residual is with x1 too.
        h1 = jnp.dot(x1.astype(jnp.bfloat16), w1_ref[l],
                     preferred_element_type=jnp.float32) + b1_ref[l]
        h1 = jnp.maximum(h1, 0.0)
        h2 = jnp.dot(h1.astype(jnp.bfloat16), w2_ref[l],
                     preferred_element_type=jnp.float32) + b2_ref[l]
        # TODO(synk): MLP Dropout(p=0.1) skipped — eval-mode semantics.
        x = h2 + x1                                                         # residual 2

    hid_ref[...] = x

    # --------------------------- classification head -------------------------
    first = x[0:1, :]                                                       # token index 0
    # TODO(synk): classifier Dropout(p=0.1) skipped — eval-mode semantics.
    logits = jnp.dot(first.astype(jnp.bfloat16), clsw_ref[...],
                     preferred_element_type=jnp.float32) + clsb_ref[...]    # (1, C_pad)
    logit_ref[...] = jnp.broadcast_to(logits, logit_ref.shape)


# ----------------------------- pallas_call wrapper ---------------------------


def vit_fused_call(patches, params, cfg):
    B, P, PD = patches.shape
    pos = params["pos_emb"]
    S_pad, H = pos.shape
    S_real = cfg["num_patch"] + 1
    L = cfg["num_layers"]
    I = params["w1"].shape[-1]
    C_pad = params["cls_w"].shape[-1]
    num_heads = cfg["num_heads"]

    kernel = functools.partial(
        _vit_fused_kernel, num_layers=L, num_heads=num_heads,
        head_dim=H // num_heads, hidden_dim=H, seq_real=S_real, seq_pad=S_pad)

    full2 = lambda i: (0, 0)
    full3 = lambda i: (0, 0, 0)

    hid, logits_pad = pl.pallas_call(
        kernel,
        grid=(B,),
        in_specs=[
            pl.BlockSpec((None, P, PD), lambda i: (i, 0, 0)),   # patches (per batch elem)
            pl.BlockSpec((PD, H), full2),                       # patch_w
            pl.BlockSpec((1, H), full2),                        # patch_b
            pl.BlockSpec((1, H), full2),                        # cls_token
            pl.BlockSpec((S_pad, H), full2),                    # pos_emb
            pl.BlockSpec((L, 1, H), full3),                     # ln1w
            pl.BlockSpec((L, 1, H), full3),                     # ln1b
            pl.BlockSpec((L, H, 3 * H), full3),                 # wqkv
            pl.BlockSpec((L, 1, 3 * H), full3),                 # bqkv
            pl.BlockSpec((L, H, H), full3),                     # wo
            pl.BlockSpec((L, 1, H), full3),                     # bo
            pl.BlockSpec((L, H, I), full3),                     # w1
            pl.BlockSpec((L, 1, I), full3),                     # b1
            pl.BlockSpec((L, I, H), full3),                     # w2
            pl.BlockSpec((L, 1, H), full3),                     # b2
            pl.BlockSpec((H, C_pad), full2),                    # cls_w
            pl.BlockSpec((1, C_pad), full2),                    # cls_b
        ],
        out_specs=[
            pl.BlockSpec((None, S_pad, H), lambda i: (i, 0, 0)),
            pl.BlockSpec((None, 8, C_pad), lambda i: (i, 0, 0)),
        ],
        out_shape=[
            jax.ShapeDtypeStruct((B, S_pad, H), jnp.float32),
            jax.ShapeDtypeStruct((B, 8, C_pad), jnp.float32),
        ],
        compiler_params=pltpu.CompilerParams(dimension_semantics=("parallel",)),
    )(patches, params["patch_w"], params["patch_b"], params["cls_token"], pos,
      params["ln1w"], params["ln1b"], params["wqkv"], params["bqkv"],
      params["wo"], params["bo"], params["w1"], params["b1"],
      params["w2"], params["b2"], params["cls_w"], params["cls_b"])
    return hid, logits_pad


# ----------------------------- glue (plain JAX) -------------------------------


def extract_patches(x, ps):
    """NCHW image -> (b, num_patch, c*ps*ps), matching Conv2d(stride=ps) im2col order."""
    b, c, Himg, Wimg = x.shape
    nh, nw = Himg // ps, Wimg // ps
    x = x.reshape(b, c, nh, ps, nw, ps)
    x = x.transpose(0, 2, 4, 1, 3, 5)            # (b, nh, nw, c, ps, ps)
    return x.reshape(b, nh * nw, c * ps * ps)


def init_params(key, cfg):
    H, I, ps = cfg["hidden_dim"], cfg["intermediate_dim"], cfg["patch_size"]
    L, num_heads = cfg["num_layers"], cfg["num_heads"]
    num_classes = cfg["num_classes"]
    head_dim = H // num_heads
    S_real = cfg["num_patch"] + 1
    S_pad = _round_up(S_real, 8)
    C_pad = _round_up(max(num_classes, 128), 128)

    keys = jax.random.split(key, 8 + 12 * L)
    k = iter(keys)
    p = {}

    p["cls_token"] = jax.random.normal(next(k), (1, H), jnp.float32)     # (1,1,H) squeezed
    pos = jax.random.normal(next(k), (S_real, H), jnp.float32)
    p["pos_emb"] = jnp.pad(pos, ((0, S_pad - S_real), (0, 0)))           # pad rows never read
    # Conv2d weight (H, 3, ps, ps) -> flattened & transposed to (3*ps*ps, H), bf16 for MXU.
    conv_w = jax.random.normal(next(k), (H, 3, ps, ps), jnp.float32) * 0.05
    p["patch_w"] = conv_w.reshape(H, 3 * ps * ps).T.astype(jnp.bfloat16)
    p["patch_b"] = (jax.random.normal(next(k), (H,), jnp.float32) * 0.05).reshape(1, H)

    scale = 1.0 / math.sqrt(head_dim)
    qscale = jnp.concatenate([jnp.full((H,), scale, jnp.float32),
                              jnp.ones((2 * H,), jnp.float32)])          # fold attn scale into Q

    ln1w, ln1b, wqkv, bqkv, wo, bo, w1, b1, w2, b2 = ([] for _ in range(10))
    for _ in range(L):
        ln1w.append(jnp.ones((1, H), jnp.float32))
        ln1b.append(jnp.zeros((1, H), jnp.float32))
        w = (jax.random.normal(next(k), (3 * H, H), jnp.float32) * 0.05).T      # (H, 3H)
        b = (jax.random.normal(next(k), (3 * H,), jnp.float32) * 0.05).reshape(1, 3 * H)
        wqkv.append((w * qscale[None, :]).astype(jnp.bfloat16))
        bqkv.append(b * qscale[None, :])
        wo.append((jax.random.normal(next(k), (H, H), jnp.float32) * 0.05).T.astype(jnp.bfloat16))
        bo.append((jax.random.normal(next(k), (H,), jnp.float32) * 0.05).reshape(1, H))
        w1.append((jax.random.normal(next(k), (I, H), jnp.float32) * 0.05).T.astype(jnp.bfloat16))
        b1.append((jax.random.normal(next(k), (I,), jnp.float32) * 0.05).reshape(1, I))
        w2.append((jax.random.normal(next(k), (H, I), jnp.float32) * 0.05).T.astype(jnp.bfloat16))
        b2.append((jax.random.normal(next(k), (H,), jnp.float32) * 0.05).reshape(1, H))
        # layer_norm2 params exist in the torch module but its output is unused -> omitted.

    p["ln1w"], p["ln1b"] = jnp.stack(ln1w), jnp.stack(ln1b)
    p["wqkv"], p["bqkv"] = jnp.stack(wqkv), jnp.stack(bqkv)
    p["wo"], p["bo"] = jnp.stack(wo), jnp.stack(bo)
    p["w1"], p["b1"] = jnp.stack(w1), jnp.stack(b1)
    p["w2"], p["b2"] = jnp.stack(w2), jnp.stack(b2)

    cls_w = (jax.random.normal(next(k), (num_classes, H), jnp.float32) * 0.05).T   # (H, C)
    cls_b = (jax.random.normal(next(k), (num_classes,), jnp.float32) * 0.05).reshape(1, num_classes)
    p["cls_w"] = jnp.pad(cls_w, ((0, 0), (0, C_pad - num_classes))).astype(jnp.bfloat16)
    p["cls_b"] = jnp.pad(cls_b, ((0, 0), (0, C_pad - num_classes)))
    return p


def vit_forward(x_nchw, params, cfg):
    patches = extract_patches(x_nchw, cfg["patch_size"])      # (B, P, 3*ps*ps)
    hid, logits_pad = vit_fused_call(patches, params, cfg)    # (B, S_pad, H), (B, 8, C_pad)
    C = cfg["num_classes"]
    return {"logits": logits_pad[:, 0, :C], "embedding": hid[:, 0, :]}


# ----------------------------- main -------------------------------------------

if __name__ == "__main__":
    # Small ViT config: 16x16 RGB image, patch 4 -> 16 patches, hidden 32,
    # 2 layers, 2 heads, intermediate 64, 10 classes, batch 2.
    B, C_IN, IMG, PS = 2, 3, 16, 4
    cfg = dict(num_classes=10, num_patch=(IMG // PS) ** 2, patch_size=PS,
               num_layers=2, num_heads=2, hidden_dim=32, intermediate_dim=64)

    key = jax.random.PRNGKey(0)
    k_x, k_p = jax.random.split(key)
    x = jax.random.normal(k_x, (B, C_IN, IMG, IMG), jnp.float32)   # NCHW like PyTorch

    params = init_params(k_p, cfg)                                 # arrays only (jit-safe)
    fwd = jax.jit(functools.partial(vit_forward, cfg=cfg))         # cfg is static via closure

    out = fwd(x, params)
    jax.block_until_ready(out)

    assert out["logits"].shape == (B, cfg["num_classes"])
    assert out["embedding"].shape == (B, cfg["hidden_dim"])
    assert bool(jnp.all(jnp.isfinite(out["logits"])))
    print("KERNEL_OK")
</pallas_src>

<mosaic_0001>
module attributes {stable_mosaic.version = 11 : i64} {
  func.func @_vit_fused_kernel(%arg0: i32, %arg1: memref<1x16x48xf32, #tpu.memory_space<vmem>>, %arg2: memref<48x32xbf16, #tpu.memory_space<vmem>>, %arg3: memref<1x32xf32, #tpu.memory_space<vmem>>, %arg4: memref<1x32xf32, #tpu.memory_space<vmem>>, %arg5: memref<24x32xf32, #tpu.memory_space<vmem>>, %arg6: memref<2x1x32xf32, #tpu.memory_space<vmem>>, %arg7: memref<2x1x32xf32, #tpu.memory_space<vmem>>, %arg8: memref<2x32x96xbf16, #tpu.memory_space<vmem>>, %arg9: memref<2x1x96xf32, #tpu.memory_space<vmem>>, %arg10: memref<2x32x32xbf16, #tpu.memory_space<vmem>>, %arg11: memref<2x1x32xf32, #tpu.memory_space<vmem>>, %arg12: memref<2x32x64xbf16, #tpu.memory_space<vmem>>, %arg13: memref<2x1x64xf32, #tpu.memory_space<vmem>>, %arg14: memref<2x64x32xbf16, #tpu.memory_space<vmem>>, %arg15: memref<2x1x32xf32, #tpu.memory_space<vmem>>, %arg16: memref<32x128xbf16, #tpu.memory_space<vmem>>, %arg17: memref<1x128xf32, #tpu.memory_space<vmem>>, %arg18: memref<1x24x32xf32, #tpu.memory_space<vmem>>, %arg19: memref<1x8x128xf32, #tpu.memory_space<vmem>>) attributes {dimension_semantics = [#tpu.dimension_semantics<parallel>], iteration_bounds = array<i64: 2>, scalar_prefetch = 0 : i64, scratch_operands = 0 : i64, tpu.core_type = #tpu.core_type<tc>, window_params = [{transform_indices = @transform_0, window_bounds = array<i64: 1, 16, 48>}, {pipeline_mode = #tpu.pipeline_mode<synchronous>, transform_indices = @transform_1, window_bounds = array<i64: 48, 32>}, {pipeline_mode = #tpu.pipeline_mode<synchronous>, transform_indices = @transform_2, window_bounds = array<i64: 1, 32>}, {pipeline_mode = #tpu.pipeline_mode<synchronous>, transform_indices = @transform_3, window_bounds = array<i64: 1, 32>}, {pipeline_mode = #tpu.pipeline_mode<synchronous>, transform_indices = @transform_4, window_bounds = array<i64: 24, 32>}, {pipeline_mode = #tpu.pipeline_mode<synchronous>, transform_indices = @transform_5, window_bounds = array<i64: 2, 1, 32>}, {pipeline_mode = #tpu.pipeline_mode<synchronous>, transform_indices = @transform_6, window_bounds = array<i64: 2, 1, 32>}, {pipeline_mode = #tpu.pipeline_mode<synchronous>, transform_indices = @transform_7, window_bounds = array<i64: 2, 32, 96>}, {pipeline_mode = #tpu.pipeline_mode<synchronous>, transform_indices = @transform_8, window_bounds = array<i64: 2, 1, 96>}, {pipeline_mode = #tpu.pipeline_mode<synchronous>, transform_indices = @transform_9, window_bounds = array<i64: 2, 32, 32>}, {pipeline_mode = #tpu.pipeline_mode<synchronous>, transform_indices = @transform_10, window_bounds = array<i64: 2, 1, 32>}, {pipeline_mode = #tpu.pipeline_mode<synchronous>, transform_indices = @transform_11, window_bounds = array<i64: 2, 32, 64>}, {pipeline_mode = #tpu.pipeline_mode<synchronous>, transform_indices = @transform_12, window_bounds = array<i64: 2, 1, 64>}, {pipeline_mode = #tpu.pipeline_mode<synchronous>, transform_indices = @transform_13, window_bounds = array<i64: 2, 64, 32>}, {pipeline_mode = #tpu.pipeline_mode<synchronous>, transform_indices = @transform_14, window_bounds = array<i64: 2, 1, 32>}, {pipeline_mode = #tpu.pipeline_mode<synchronous>, transform_indices = @transform_15, window_bounds = array<i64: 32, 128>}, {pipeline_mode = #tpu.pipeline_mode<synchronous>, transform_indices = @transform_16, window_bounds = array<i64: 1, 128>}, {transform_indices = @transform_17, window_bounds = array<i64: 1, 24, 32>}, {transform_indices = @transform_18, window_bounds = array<i64: 1, 8, 128>}]} {
    %c0 = arith.constant 0 : index
    %c0_0 = arith.constant 0 : index
    %c0_1 = arith.constant 0 : index
    %0 = vector.load %arg1[%c0, %c0_0, %c0_1] : memref<1x16x48xf32, #tpu.memory_space<vmem>>, vector<1x16x48xf32>
    %1 = vector.shape_cast %0 : vector<1x16x48xf32> to vector<16x48xf32>
    %2 = arith.truncf %1 : vector<16x48xf32> to vector<16x48xbf16>
    %c0_2 = arith.constant 0 : index
    %c0_3 = arith.constant 0 : index
    %3 = vector.load %arg2[%c0_2, %c0_3] : memref<48x32xbf16, #tpu.memory_space<vmem>>, vector<48x32xbf16>
    %cst = arith.constant dense<0.000000e+00> : vector<16x32xf32>
    %4 = tpu.matmul %2, %3, %cst {dimension_numbers = #tpu.dot_dimension_numbers<[1], [0], [0], [1], [0, 0, 1, 1], [], []>} : vector<16x48xbf16>, vector<48x32xbf16>, vector<16x32xf32> -> vector<16x32xf32>
    %c0_4 = arith.constant 0 : index
    %c0_5 = arith.constant 0 : index
    %5 = vector.load %arg3[%c0_4, %c0_5] : memref<1x32xf32, #tpu.memory_space<vmem>>, vector<1x32xf32>
    %6 = vector.broadcast %5 : vector<1x32xf32> to vector<16x32xf32>
    %7 = arith.addf %4, %6 : vector<16x32xf32>
    %c0_6 = arith.constant 0 : index
    %c0_7 = arith.constant 0 : index
    %8 = vector.load %arg5[%c0_6, %c0_7] : memref<24x32xf32, #tpu.memory_space<vmem>>, vector<16x32xf32>
    %9 = arith.addf %7, %8 : vector<16x32xf32>
    %c0_8 = arith.constant 0 : index
    %c0_9 = arith.constant 0 : index
    %c0_10 = arith.constant 0 : index
    %10 = vector.load %arg18[%c0_8, %c0_9, %c0_10] : memref<1x24x32xf32, #tpu.memory_space<vmem>>, vector<1x16x32xf32>
    %11 = vector.shape_cast %10 : vector<1x16x32xf32> to vector<16x32xf32>
    %12 = vector.shape_cast %9 : vector<16x32xf32> to vector<1x16x32xf32>
    tpu.vector_store %arg18[%c0_8, %c0_9, %c0_10], %12 {strides = array<i32>} : memref<1x24x32xf32, #tpu.memory_space<vmem>>, vector<1x16x32xf32>,
    %c0_11 = arith.constant 0 : index
    %c0_12 = arith.constant 0 : index
    %13 = vector.load %arg4[%c0_11, %c0_12] : memref<1x32xf32, #tpu.memory_space<vmem>>, vector<1x32xf32>
    %c16 = arith.constant 16 : index
    %c0_13 = arith.constant 0 : index
    %14 = vector.load %arg5[%c16, %c0_13] : memref<24x32xf32, #tpu.memory_space<vmem>>, vector<1x32xf32>
    %15 = arith.addf %13, %14 : vector<1x32xf32>
    %c0_14 = arith.constant 0 : index
    %c16_15 = arith.constant 16 : index
    %c0_16 = arith.constant 0 : index
    %16 = vector.load %arg18[%c0_14, %c16_15, %c0_16] : memref<1x24x32xf32, #tpu.memory_space<vmem>>, vector<1x1x32xf32>
    %17 = vector.shape_cast %16 : vector<1x1x32xf32> to vector<1x32xf32>
    %18 = vector.shape_cast %15 : vector<1x32xf32> to vector<1x1x32xf32>
    tpu.vector_store %arg18[%c0_14, %c16_15, %c0_16], %18 {strides = array<i32>} : memref<1x24x32xf32, #tpu.memory_space<vmem>>, vector<1x1x32xf32>,
    %cst_17 = arith.constant 0.000000e+00 : f32
    %19 = vector.broadcast %cst_17 : f32 to vector<7x32xf32>
    %c0_18 = arith.constant 0 : index
    %c17 = arith.constant 17 : index
    %c0_19 = arith.constant 0 : index
    %20 = vector.load %arg18[%c0_18, %c17, %c0_19] : memref<1x24x32xf32, #tpu.memory_space<vmem>>, vector<1x7x32xf32>
    %21 = vector.shape_cast %20 : vector<1x7x32xf32> to vector<7x32xf32>
    %22 = vector.shape_cast %19 : vector<7x32xf32> to vector<1x7x32xf32>
    tpu.vector_store %arg18[%c0_18, %c17, %c0_19], %22 {strides = array<i32>} : memref<1x24x32xf32, #tpu.memory_space<vmem>>, vector<1x7x32xf32>,
    %c0_20 = arith.constant 0 : index
    %c0_21 = arith.constant 0 : index
    %c0_22 = arith.constant 0 : index
    %23 = vector.load %arg18[%c0_20, %c0_21, %c0_22] : memref<1x24x32xf32, #tpu.memory_space<vmem>>, vector<1x24x32xf32>
    %24 = vector.shape_cast %23 : vector<1x24x32xf32> to vector<24x32xf32>
    %25 = tpu.iota {dimensions = array<i32: 1>} : vector<1x24xi32>
    %c17_i32 = arith.constant 17 : i32
    %26 = vector.broadcast %c17_i32 : i32 to vector<1x24xi32>
    %27 = arith.cmpi slt, %25, %26 : vector<1x24xi32>
    %cst_23 = arith.constant 0.000000e+00 : f32
    %cst_24 = arith.constant -1.000000e+30 : f32
    %28 = vector.broadcast %cst_23 : f32 to vector<1x24xf32>
    %29 = vector.broadcast %cst_24 : f32 to vector<1x24xf32>
    %30 = arith.select %27, %28, %29 : vector<1x24xi1>, vector<1x24xf32>
    %c0_25 = arith.constant 0 : index
    %c0_26 = arith.constant 0 : index
    %c0_27 = arith.constant 0 : index
    %31 = vector.load %arg6[%c0_25, %c0_26, %c0_27] : memref<2x1x32xf32, #tpu.memory_space<vmem>>, vector<1x1x32xf32>
    %32 = vector.shape_cast %31 : vector<1x1x32xf32> to vector<1x32xf32>
    %c0_28 = arith.constant 0 : index
    %c0_29 = arith.constant 0 : index
    %c0_30 = arith.constant 0 : index
    %33 = vector.load %arg7[%c0_28, %c0_29, %c0_30] : memref<2x1x32xf32, #tpu.memory_space<vmem>>, vector<1x1x32xf32>
    %34 = vector.shape_cast %33 : vector<1x1x32xf32> to vector<1x32xf32>
    %cst_31 = arith.constant dense<0.000000e+00> : vector<24xf32>
    %35 = vector.multi_reduction <add>, %24, %cst_31 [1] : vector<24x32xf32> to vector<24xf32>
    %36 = vector.shape_cast %35 : vector<24xf32> to vector<24x1xf32>
    %cst_32 = arith.constant 3.200000e+01 : f32
    %37 = vector.broadcast %cst_32 : f32 to vector<24x1xf32>
    %38 = arith.divf %36, %37 : vector<24x1xf32>
    %39 = vector.broadcast %38 : vector<24x1xf32> to vector<24x32xf32>
    %40 = arith.subf %24, %39 : vector<24x32xf32>
    %41 = arith.mulf %40, %40 : vector<24x32xf32>
    %cst_33 = arith.constant dense<0.000000e+00> : vector<24xf32>
    %42 = vector.multi_reduction <add>, %41, %cst_33 [1] : vector<24x32xf32> to vector<24xf32>
    %43 = vector.shape_cast %42 : vector<24xf32> to vector<24x1xf32>
    %cst_34 = arith.constant 3.200000e+01 : f32
    %44 = vector.broadcast %cst_34 : f32 to vector<24x1xf32>
    %45 = arith.divf %43, %44 : vector<24x1xf32>
    %46 = vector.broadcast %38 : vector<24x1xf32> to vector<24x32xf32>
    %47 = arith.subf %24, %46 : vector<24x32xf32>
    %cst_35 = arith.constant 9.99999974E-6 : f32
    %48 = vector.broadcast %cst_35 : f32 to vector<24x1xf32>
    %49 = arith.addf %45, %48 : vector<24x1xf32>
    %50 = math.rsqrt %49 : vector<24x1xf32>
    %51 = vector.broadcast %50 : vector<24x1xf32> to vector<24x32xf32>
    %52 = arith.mulf %47, %51 : vector<24x32xf32>
    %53 = vector.broadcast %32 : vector<1x32xf32> to vector<24x32xf32>
    %54 = arith.mulf %52, %53 : vector<24x32xf32>
    %55 = vector.broadcast %34 : vector<1x32xf32> to vector<24x32xf32>
    %56 = arith.addf %54, %55 : vector<24x32xf32>
    %57 = arith.truncf %56 : vector<24x32xf32> to vector<24x32xbf16>
    %c0_36 = arith.constant 0 : index
    %c0_37 = arith.constant 0 : index
    %c0_38 = arith.constant 0 : index
    %58 = vector.load %arg8[%c0_36, %c0_37, %c0_38] : memref<2x32x96xbf16, #tpu.memory_space<vmem>>, vector<1x32x96xbf16>
    %59 = vector.shape_cast %58 : vector<1x32x96xbf16> to vector<32x96xbf16>
    %cst_39 = arith.constant dense<0.000000e+00> : vector<24x96xf32>
    %60 = tpu.matmul %57, %59, %cst_39 {dimension_numbers = #tpu.dot_dimension_numbers<[1], [0], [0], [1], [0, 0, 1, 1], [], []>} : vector<24x32xbf16>, vector<32x96xbf16>, vector<24x96xf32> -> vector<24x96xf32>
    %c0_40 = arith.constant 0 : index
    %c0_41 = arith.constant 0 : index
    %c0_42 = arith.constant 0 : index
    %61 = vector.load %arg9[%c0_40, %c0_41, %c0_42] : memref<2x1x96xf32, #tpu.memory_space<vmem>>, vector<1x1x96xf32>
    %62 = vector.shape_cast %61 : vector<1x1x96xf32> to vector<1x96xf32>
    %63 = vector.broadcast %62 : vector<1x96xf32> to vector<24x96xf32>
    %64 = arith.addf %60, %63 : vector<24x96xf32>
    %c0_43 = arith.constant 0 : index
    %c0_44 = arith.constant 0 : index
    %c0_45 = arith.constant 0 : index
    %65 = vector.load %arg10[%c0_43, %c0_44, %c0_45] : memref<2x32x32xbf16, #tpu.memory_space<vmem>>, vector<1x32x32xbf16>
    %66 = vector.shape_cast %65 : vector<1x32x32xbf16> to vector<32x32xbf16>
    %cst_46 = arith.constant 0.000000e+00 : f32
    %67 = vector.broadcast %cst_46 : f32 to vector<24x32xf32>
    %68 = vector.extract_strided_slice %64 {offsets = [0, 0], sizes = [24, 16], strides = [1, 1]} : vector<24x96xf32> to vector<24x16xf32>
    %69 = vector.extract_strided_slice %64 {offsets = [0, 32], sizes = [24, 16], strides = [1, 1]} : vector<24x96xf32> to vector<24x16xf32>
    %70 = vector.extract_strided_slice %64 {offsets = [0, 64], sizes = [24, 16], strides = [1, 1]} : vector<24x96xf32> to vector<24x16xf32>
    %71 = arith.truncf %68 : vector<24x16xf32> to vector<24x16xbf16>
    %72 = arith.truncf %69 : vector<24x16xf32> to vector<24x16xbf16>
    %cst_47 = arith.constant dense<0.000000e+00> : vector<24x24xf32>
    %73 = tpu.matmul %71, %72, %cst_47 {dimension_numbers = #tpu.dot_dimension_numbers<[1], [1], [0], [0], [0, 0, 1, 0], [], []>} : vector<24x16xbf16>, vector<24x16xbf16>, vector<24x24xf32> -> vector<24x24xf32>
    %74 = vector.broadcast %30 : vector<1x24xf32> to vector<24x24xf32>
    %75 = arith.addf %73, %74 : vector<24x24xf32>
    %cst_48 = arith.constant dense<0xFF800000> : vector<24xf32>
    %76 = vector.multi_reduction <maximumf>, %75, %cst_48 [1] : vector<24x24xf32> to vector<24xf32>
    %77 = vector.shape_cast %76 : vector<24xf32> to vector<24x1xf32>
    %78 = vector.broadcast %77 : vector<24x1xf32> to vector<24x24xf32>
    %79 = arith.subf %75, %78 : vector<24x24xf32>
    %80 = math.exp %79 : vector<24x24xf32>
    %cst_49 = arith.constant dense<0.000000e+00> : vector<24xf32>
    %81 = vector.multi_reduction <add>, %80, %cst_49 [1] : vector<24x24xf32> to vector<24xf32>
    %82 = vector.shape_cast %81 : vector<24xf32> to vector<24x1xf32>
    %83 = tpu.reciprocal %82 {approx = true} : vector<24x1xf32> -> vector<24x1xf32>
    %84 = vector.broadcast %83 : vector<24x1xf32> to vector<24x24xf32>
    %85 = arith.mulf %80, %84 : vector<24x24xf32>
    %86 = arith.truncf %85 : vector<24x24xf32> to vector<24x24xbf16>
    %87 = arith.truncf %70 : vector<24x16xf32> to vector<24x16xbf16>
    %cst_50 = arith.constant dense<0.000000e+00> : vector<24x16xf32>
    %88 = tpu.matmul %86, %87, %cst_50 {dimension_numbers = #tpu.dot_dimension_numbers<[1], [0], [0], [1], [0, 0, 1, 1], [], []>} : vector<24x24xbf16>, vector<24x16xbf16>, vector<24x16xf32> -> vector<24x16xf32>
    %89 = arith.truncf %88 : vector<24x16xf32> to vector<24x16xbf16>
    %90 = vector.extract_strided_slice %66 {offsets = [0, 0], sizes = [16, 32], strides = [1, 1]} : vector<32x32xbf16> to vector<16x32xbf16>
    %cst_51 = arith.constant dense<0.000000e+00> : vector<24x32xf32>
    %91 = tpu.matmul %89, %90, %cst_51 {dimension_numbers = #tpu.dot_dimension_numbers<[1], [0], [0], [1], [0, 0, 1, 1], [], []>} : vector<24x16xbf16>, vector<16x32xbf16>, vector<24x32xf32> -> vector<24x32xf32>
    %92 = arith.addf %67, %91 : vector<24x32xf32>
    %93 = vector.extract_strided_slice %64 {offsets = [0, 16], sizes = [24, 16], strides = [1, 1]} : vector<24x96xf32> to vector<24x16xf32>
    %94 = vector.extract_strided_slice %64 {offsets = [0, 48], sizes = [24, 16], strides = [1, 1]} : vector<24x96xf32> to vector<24x16xf32>
    %95 = vector.extract_strided_slice %64 {offsets = [0, 80], sizes = [24, 16], strides = [1, 1]} : vector<24x96xf32> to vector<24x16xf32>
    %96 = arith.truncf %93 : vector<24x16xf32> to vector<24x16xbf16>
    %97 = arith.truncf %94 : vector<24x16xf32> to vector<24x16xbf16>
    %cst_52 = arith.constant dense<0.000000e+00> : vector<24x24xf32>
    %98 = tpu.matmul %96, %97, %cst_52 {dimension_numbers = #tpu.dot_dimension_numbers<[1], [1], [0], [0], [0, 0, 1, 0], [], []>} : vector<24x16xbf16>, vector<24x16xbf16>, vector<24x24xf32> -> vector<24x24xf32>
    %99 = vector.broadcast %30 : vector<1x24xf32> to vector<24x24xf32>
    %100 = arith.addf %98, %99 : vector<24x24xf32>
    %cst_53 = arith.constant dense<0xFF800000> : vector<24xf32>
    %101 = vector.multi_reduction <maximumf>, %100, %cst_53 [1] : vector<24x24xf32> to vector<24xf32>
    %102 = vector.shape_cast %101 : vector<24xf32> to vector<24x1xf32>
    %103 = vector.broadcast %102 : vector<24x1xf32> to vector<24x24xf32>
    %104 = arith.subf %100, %103 : vector<24x24xf32>
    %105 = math.exp %104 : vector<24x24xf32>
    %cst_54 = arith.constant dense<0.000000e+00> : vector<24xf32>
    %106 = vector.multi_reduction <add>, %105, %cst_54 [1] : vector<24x24xf32> to vector<24xf32>
    %107 = vector.shape_cast %106 : vector<24xf32> to vector<24x1xf32>
    %108 = tpu.reciprocal %107 {approx = true} : vector<24x1xf32> -> vector<24x1xf32>
    %109 = vector.broadcast %108 : vector<24x1xf32> to vector<24x24xf32>
    %110 = arith.mulf %105, %109 : vector<24x24xf32>
    %111 = arith.truncf %110 : vector<24x24xf32> to vector<24x24xbf16>
    %112 = arith.truncf %95 : vector<24x16xf32> to vector<24x16xbf16>
    %cst_55 = arith.constant dense<0.000000e+00> : vector<24x16xf32>
    %113 = tpu.matmul %111, %112, %cst_55 {dimension_numbers = #tpu.dot_dimension_numbers<[1], [0], [0], [1], [0, 0, 1, 1], [], []>} : vector<24x24xbf16>, vector<24x16xbf16>, vector<24x16xf32> -> vector<24x16xf32>
    %114 = arith.truncf %113 : vector<24x16xf32> to vector<24x16xbf16>
    %115 = vector.extract_strided_slice %66 {offsets = [16, 0], sizes = [16, 32], strides = [1, 1]} : vector<32x32xbf16> to vector<16x32xbf16>
    %cst_56 = arith.constant dense<0.000000e+00> : vector<24x32xf32>
    %116 = tpu.matmul %114, %115, %cst_56 {dimension_numbers = #tpu.dot_dimension_numbers<[1], [0], [0], [1], [0, 0, 1, 1], [], []>} : vector<24x16xbf16>, vector<16x32xbf16>, vector<24x32xf32> -> vector<24x32xf32>
    %117 = arith.addf %92, %116 : vector<24x32xf32>
    %c0_57 = arith.constant 0 : index
    %c0_58 = arith.constant 0 : index
    %c0_59 = arith.constant 0 : index
    %118 = vector.load %arg11[%c0_57, %c0_58, %c0_59] : memref<2x1x32xf32, #tpu.memory_space<vmem>>, vector<1x1x32xf32>
    %119 = vector.shape_cast %118 : vector<1x1x32xf32> to vector<1x32xf32>
    %120 = vector.broadcast %119 : vector<1x32xf32> to vector<24x32xf32>
    %121 = arith.addf %117, %120 : vector<24x32xf32>
    %122 = arith.addf %121, %24 : vector<24x32xf32>
    %123 = arith.truncf %122 : vector<24x32xf32> to vector<24x32xbf16>
    %c0_60 = arith.constant 0 : index
    %c0_61 = arith.constant 0 : index
    %c0_62 = arith.constant 0 : index
    %124 = vector.load %arg12[%c0_60, %c0_61, %c0_62] : memref<2x32x64xbf16, #tpu.memory_space<vmem>>, vector<1x32x64xbf16>
    %125 = vector.shape_cast %124 : vector<1x32x64xbf16> to vector<32x64xbf16>
    %cst_63 = arith.constant dense<0.000000e+00> : vector<24x64xf32>
    %126 = tpu.matmul %123, %125, %cst_63 {dimension_numbers = #tpu.dot_dimension_numbers<[1], [0], [0], [1], [0, 0, 1, 1], [], []>} : vector<24x32xbf16>, vector<32x64xbf16>, vector<24x64xf32> -> vector<24x64xf32>
    %c0_64 = arith.constant 0 : index
    %c0_65 = arith.constant 0 : index
    %c0_66 = arith.constant 0 : index
    %127 = vector.load %arg13[%c0_64, %c0_65, %c0_66] : memref<2x1x64xf32, #tpu.memory_space<vmem>>, vector<1x1x64xf32>
    %128 = vector.shape_cast %127 : vector<1x1x64xf32> to vector<1x64xf32>
    %129 = vector.broadcast %128 : vector<1x64xf32> to vector<24x64xf32>
    %130 = arith.addf %126, %129 : vector<24x64xf32>
    %cst_67 = arith.constant 0.000000e+00 : f32
    %131 = vector.broadcast %cst_67 : f32 to vector<24x64xf32>
    %132 = arith.maximumf %130, %131 : vector<24x64xf32>
    %133 = arith.truncf %132 : vector<24x64xf32> to vector<24x64xbf16>
    %c0_68 = arith.constant 0 : index
    %c0_69 = arith.constant 0 : index
    %c0_70 = arith.constant 0 : index
    %134 = vector.load %arg14[%c0_68, %c0_69, %c0_70] : memref<2x64x32xbf16, #tpu.memory_space<vmem>>, vector<1x64x32xbf16>
    %135 = vector.shape_cast %134 : vector<1x64x32xbf16> to vector<64x32xbf16>
    %cst_71 = arith.constant dense<0.000000e+00> : vector<24x32xf32>
    %136 = tpu.matmul %133, %135, %cst_71 {dimension_numbers = #tpu.dot_dimension_numbers<[1], [0], [0], [1], [0, 0, 1, 1], [], []>} : vector<24x64xbf16>, vector<64x32xbf16>, vector<24x32xf32> -> vector<24x32xf32>
    %c0_72 = arith.constant 0 : index
    %c0_73 = arith.constant 0 : index
    %c0_74 = arith.constant 0 : index
    %137 = vector.load %arg15[%c0_72, %c0_73, %c0_74] : memref<2x1x32xf32, #tpu.memory_space<vmem>>, vector<1x1x32xf32>
    %138 = vector.shape_cast %137 : vector<1x1x32xf32> to vector<1x32xf32>
    %139 = vector.broadcast %138 : vector<1x32xf32> to vector<24x32xf32>
    %140 = arith.addf %136, %139 : vector<24x32xf32>
    %141 = arith.addf %140, %122 : vector<24x32xf32>
    %c1 = arith.constant 1 : index
    %c0_75 = arith.constant 0 : index
    %c0_76 = arith.constant 0 : index
    %142 = vector.load %arg6[%c1, %c0_75, %c0_76] : memref<2x1x32xf32, #tpu.memory_space<vmem>>, vector<1x1x32xf32>
    %143 = vector.shape_cast %142 : vector<1x1x32xf32> to vector<1x32xf32>
    %c1_77 = arith.constant 1 : index
    %c0_78 = arith.constant 0 : index
    %c0_79 = arith.constant 0 : index
    %144 = vector.load %arg7[%c1_77, %c0_78, %c0_79] : memref<2x1x32xf32, #tpu.memory_space<vmem>>, vector<1x1x32xf32>
    %145 = vector.shape_cast %144 : vector<1x1x32xf32> to vector<1x32xf32>
    %cst_80 = arith.constant dense<0.000000e+00> : vector<24xf32>
    %146 = vector.multi_reduction <add>, %141, %cst_80 [1] : vector<24x32xf32> to vector<24xf32>
    %147 = vector.shape_cast %146 : vector<24xf32> to vector<24x1xf32>
    %cst_81 = arith.constant 3.200000e+01 : f32
    %148 = vector.broadcast %cst_81 : f32 to vector<24x1xf32>
    %149 = arith.divf %147, %148 : vector<24x1xf32>
    %150 = vector.broadcast %149 : vector<24x1xf32> to vector<24x32xf32>
    %151 = arith.subf %141, %150 : vector<24x32xf32>
    %152 = arith.mulf %151, %151 : vector<24x32xf32>
    %cst_82 = arith.constant dense<0.000000e+00> : vector<24xf32>
    %153 = vector.multi_reduction <add>, %152, %cst_82 [1] : vector<24x32xf32> to vector<24xf32>
    %154 = vector.shape_cast %153 : vector<24xf32> to vector<24x1xf32>
    %cst_83 = arith.constant 3.200000e+01 : f32
    %155 = vector.broadcast %cst_83 : f32 to vector<24x1xf32>
    %156 = arith.divf %154, %155 : vector<24x1xf32>
    %157 = vector.broadcast %149 : vector<24x1xf32> to vector<24x32xf32>
    %158 = arith.subf %141, %157 : vector<24x32xf32>
    %cst_84 = arith.constant 9.99999974E-6 : f32
    %159 = vector.broadcast %cst_84 : f32 to vector<24x1xf32>
    %160 = arith.addf %156, %159 : vector<24x1xf32>
    %161 = math.rsqrt %160 : vector<24x1xf32>
    %162 = vector.broadcast %161 : vector<24x1xf32> to vector<24x32xf32>
    %163 = arith.mulf %158, %162 : vector<24x32xf32>
    %164 = vector.broadcast %143 : vector<1x32xf32> to vector<24x32xf32>
    %165 = arith.mulf %163, %164 : vector<24x32xf32>
    %166 = vector.broadcast %145 : vector<1x32xf32> to vector<24x32xf32>
    %167 = arith.addf %165, %166 : vector<24x32xf32>
    %168 = arith.truncf %167 : vector<24x32xf32> to vector<24x32xbf16>
    %c1_85 = arith.constant 1 : index
    %c0_86 = arith.constant 0 : index
    %c0_87 = arith.constant 0 : index
    %169 = vector.load %arg8[%c1_85, %c0_86, %c0_87] : memref<2x32x96xbf16, #tpu.memory_space<vmem>>, vector<1x32x96xbf16>
    %170 = vector.shape_cast %169 : vector<1x32x96xbf16> to vector<32x96xbf16>
    %cst_88 = arith.constant dense<0.000000e+00> : vector<24x96xf32>
    %171 = tpu.matmul %168, %170, %cst_88 {dimension_numbers = #tpu.dot_dimension_numbers<[1], [0], [0], [1], [0, 0, 1, 1], [], []>} : vector<24x32xbf16>, vector<32x96xbf16>, vector<24x96xf32> -> vector<24x96xf32>
    %c1_89 = arith.constant 1 : index
    %c0_90 = arith.constant 0 : index
    %c0_91 = arith.constant 0 : index
    %172 = vector.load %arg9[%c1_89, %c0_90, %c0_91] : memref<2x1x96xf32, #tpu.memory_space<vmem>>, vector<1x1x96xf32>
    %173 = vector.shape_cast %172 : vector<1x1x96xf32> to vector<1x96xf32>
    %174 = vector.broadcast %173 : vector<1x96xf32> to vector<24x96xf32>
    %175 = arith.addf %171, %174 : vector<24x96xf32>
    %c1_92 = arith.constant 1 : index
    %c0_93 = arith.constant 0 : index
    %c0_94 = arith.constant 0 : index
    %176 = vector.load %arg10[%c1_92, %c0_93, %c0_94] : memref<2x32x32xbf16, #tpu.memory_space<vmem>>, vector<1x32x32xbf16>
    %177 = vector.shape_cast %176 : vector<1x32x32xbf16> to vector<32x32xbf16>
    %cst_95 = arith.constant 0.000000e+00 : f32
    %178 = vector.broadcast %cst_95 : f32 to vector<24x32xf32>
    %179 = vector.extract_strided_slice %175 {offsets = [0, 0], sizes = [24, 16], strides = [1, 1]} : vector<24x96xf32> to vector<24x16xf32>
    %180 = vector.extract_strided_slice %175 {offsets = [0, 32], sizes = [24, 16], strides = [1, 1]} : vector<24x96xf32> to vector<24x16xf32>
    %181 = vector.extract_strided_slice %175 {offsets = [0, 64], sizes = [24, 16], strides = [1, 1]} : vector<24x96xf32> to vector<24x16xf32>
    %182 = arith.truncf %179 : vector<24x16xf32> to vector<24x16xbf16>
    %183 = arith.truncf %180 : vector<24x16xf32> to vector<24x16xbf16>
    %cst_96 = arith.constant dense<0.000000e+00> : vector<24x24xf32>
    %184 = tpu.matmul %182, %183, %cst_96 {dimension_numbers = #tpu.dot_dimension_numbers<[1], [1], [0], [0], [0, 0, 1, 0], [], []>} : vector<24x16xbf16>, vector<24x16xbf16>, vector<24x24xf32> -> vector<24x24xf32>
    %185 = vector.broadcast %30 : vector<1x24xf32> to vector<24x24xf32>
    %186 = arith.addf %184, %185 : vector<24x24xf32>
    %cst_97 = arith.constant dense<0xFF800000> : vector<24xf32>
    %187 = vector.multi_reduction <maximumf>, %186, %cst_97 [1] : vector<24x24xf32> to vector<24xf32>
    %188 = vector.shape_cast %187 : vector<24xf32> to vector<24x1xf32>
    %189 = vector.broadcast %188 : vector<24x1xf32> to vector<24x24xf32>
    %190 = arith.subf %186, %189 : vector<24x24xf32>
    %191 = math.exp %190 : vector<24x24xf32>
    %cst_98 = arith.constant dense<0.000000e+00> : vector<24xf32>
    %192 = vector.multi_reduction <add>, %191, %cst_98 [1] : vector<24x24xf32> to vector<24xf32>
    %193 = vector.shape_cast %192 : vector<24xf32> to vector<24x1xf32>
    %194 = tpu.reciprocal %193 {approx = true} : vector<24x1xf32> -> vector<24x1xf32>
    %195 = vector.broadcast %194 : vector<24x1xf32> to vector<24x24xf32>
    %196 = arith.mulf %191, %195 : vector<24x24xf32>
    %197 = arith.truncf %196 : vector<24x24xf32> to vector<24x24xbf16>
    %198 = arith.truncf %181 : vector<24x16xf32> to vector<24x16xbf16>
    %cst_99 = arith.constant dense<0.000000e+00> : vector<24x16xf32>
    %199 = tpu.matmul %197, %198, %cst_99 {dimension_numbers = #tpu.dot_dimension_numbers<[1], [0], [0], [1], [0, 0, 1, 1], [], []>} : vector<24x24xbf16>, vector<24x16xbf16>, vector<24x16xf32> -> vector<24x16xf32>
    %200 = arith.truncf %199 : vector<24x16xf32> to vector<24x16xbf16>
    %201 = vector.extract_strided_slice %177 {offsets = [0, 0], sizes = [16, 32], strides = [1, 1]} : vector<32x32xbf16> to vector<16x32xbf16>
    %cst_100 = arith.constant dense<0.000000e+00> : vector<24x32xf32>
    %202 = tpu.matmul %200, %201, %cst_100 {dimension_numbers = #tpu.dot_dimension_numbers<[1], [0], [0], [1], [0, 0, 1, 1], [], []>} : vector<24x16xbf16>, vector<16x32xbf16>, vector<24x32xf32> -> vector<24x32xf32>
    %203 = arith.addf %178, %202 : vector<24x32xf32>
    %204 = vector.extract_strided_slice %175 {offsets = [0, 16], sizes = [24, 16], strides = [1, 1]} : vector<24x96xf32> to vector<24x16xf32>
    %205 = vector.extract_strided_slice %175 {offsets = [0, 48], sizes = [24, 16], strides = [1, 1]} : vector<24x96xf32> to vector<24x16xf32>
    %206 = vector.extract_strided_slice %175 {offsets = [0, 80], sizes = [24, 16], strides = [1, 1]} : vector<24x96xf32> to vector<24x16xf32>
    %207 = arith.truncf %204 : vector<24x16xf32> to vector<24x16xbf16>
    %208 = arith.truncf %205 : vector<24x16xf32> to vector<24x16xbf16>
    %cst_101 = arith.constant dense<0.000000e+00> : vector<24x24xf32>
    %209 = tpu.matmul %207, %208, %cst_101 {dimension_numbers = #tpu.dot_dimension_numbers<[1], [1], [0], [0], [0, 0, 1, 0], [], []>} : vector<24x16xbf16>, vector<24x16xbf16>, vector<24x24xf32> -> vector<24x24xf32>
    %210 = vector.broadcast %30 : vector<1x24xf32> to vector<24x24xf32>
    %211 = arith.addf %209, %210 : vector<24x24xf32>
    %cst_102 = arith.constant dense<0xFF800000> : vector<24xf32>
    %212 = vector.multi_reduction <maximumf>, %211, %cst_102 [1] : vector<24x24xf32> to vector<24xf32>
    %213 = vector.shape_cast %212 : vector<24xf32> to vector<24x1xf32>
    %214 = vector.broadcast %213 : vector<24x1xf32> to vector<24x24xf32>
    %215 = arith.subf %211, %214 : vector<24x24xf32>
    %216 = math.exp %215 : vector<24x24xf32>
    %cst_103 = arith.constant dense<0.000000e+00> : vector<24xf32>
    %217 = vector.multi_reduction <add>, %216, %cst_103 [1] : vector<24x24xf32> to vector<24xf32>
    %218 = vector.shape_cast %217 : vector<24xf32> to vector<24x1xf32>
    %219 = tpu.reciprocal %218 {approx = true} : vector<24x1xf32> -> vector<24x1xf32>
    %220 = vector.broadcast %219 : vector<24x1xf32> to vector<24x24xf32>
    %221 = arith.mulf %216, %220 : vector<24x24xf32>
    %222 = arith.truncf %221 : vector<24x24xf32> to vector<24x24xbf16>
    %223 = arith.truncf %206 : vector<24x16xf32> to vector<24x16xbf16>
    %cst_104 = arith.constant dense<0.000000e+00> : vector<24x16xf32>
    %224 = tpu.matmul %222, %223, %cst_104 {dimension_numbers = #tpu.dot_dimension_numbers<[1], [0], [0], [1], [0, 0, 1, 1], [], []>} : vector<24x24xbf16>, vector<24x16xbf16>, vector<24x16xf32> -> vector<24x16xf32>
    %225 = arith.truncf %224 : vector<24x16xf32> to vector<24x16xbf16>
    %226 = vector.extract_strided_slice %177 {offsets = [16, 0], sizes = [16, 32], strides = [1, 1]} : vector<32x32xbf16> to vector<16x32xbf16>
    %cst_105 = arith.constant dense<0.000000e+00> : vector<24x32xf32>
    %227 = tpu.matmul %225, %226, %cst_105 {dimension_numbers = #tpu.dot_dimension_numbers<[1], [0], [0], [1], [0, 0, 1, 1], [], []>} : vector<24x16xbf16>, vector<16x32xbf16>, vector<24x32xf32> -> vector<24x32xf32>
    %228 = arith.addf %203, %227 : vector<24x32xf32>
    %c1_106 = arith.constant 1 : index
    %c0_107 = arith.constant 0 : index
    %c0_108 = arith.constant 0 : index
    %229 = vector.load %arg11[%c1_106, %c0_107, %c0_108] : memref<2x1x32xf32, #tpu.memory_space<vmem>>, vector<1x1x32xf32>
    %230 = vector.shape_cast %229 : vector<1x1x32xf32> to vector<1x32xf32>
    %231 = vector.broadcast %230 : vector<1x32xf32> to vector<24x32xf32>
    %232 = arith.addf %228, %231 : vector<24x32xf32>
    %233 = arith.addf %232, %141 : vector<24x32xf32>
    %234 = arith.truncf %233 : vector<24x32xf32> to vector<24x32xbf16>
    %c1_109 = arith.constant 1 : index
    %c0_110 = arith.constant 0 : index
    %c0_111 = arith.constant 0 : index
    %235 = vector.load %arg12[%c1_109, %c0_110, %c0_111] : memref<2x32x64xbf16, #tpu.memory_space<vmem>>, vector<1x32x64xbf16>
    %236 = vector.shape_cast %235 : vector<1x32x64xbf16> to vector<32x64xbf16>
    %cst_112 = arith.constant dense<0.000000e+00> : vector<24x64xf32>
    %237 = tpu.matmul %234, %236, %cst_112 {dimension_numbers = #tpu.dot_dimension_numbers<[1], [0], [0], [1], [0, 0, 1, 1], [], []>} : vector<24x32xbf16>, vector<32x64xbf16>, vector<24x64xf32> -> vector<24x64xf32>
    %c1_113 = arith.constant 1 : index
    %c0_114 = arith.constant 0 : index
    %c0_115 = arith.constant 0 : index
    %238 = vector.load %arg13[%c1_113, %c0_114, %c0_115] : memref<2x1x64xf32, #tpu.memory_space<vmem>>, vector<1x1x64xf32>
    %239 = vector.shape_cast %238 : vector<1x1x64xf32> to vector<1x64xf32>
    %240 = vector.broadcast %239 : vector<1x64xf32> to vector<24x64xf32>
    %241 = arith.addf %237, %240 : vector<24x64xf32>
    %cst_116 = arith.constant 0.000000e+00 : f32
    %242 = vector.broadcast %cst_116 : f32 to vector<24x64xf32>
    %243 = arith.maximumf %241, %242 : vector<24x64xf32>
    %244 = arith.truncf %243 : vector<24x64xf32> to vector<24x64xbf16>
    %c1_117 = arith.constant 1 : index
    %c0_118 = arith.constant 0 : index
    %c0_119 = arith.constant 0 : index
    %245 = vector.load %arg14[%c1_117, %c0_118, %c0_119] : memref<2x64x32xbf16, #tpu.memory_space<vmem>>, vector<1x64x32xbf16>
    %246 = vector.shape_cast %245 : vector<1x64x32xbf16> to vector<64x32xbf16>
    %cst_120 = arith.constant dense<0.000000e+00> : vector<24x32xf32>
    %247 = tpu.matmul %244, %246, %cst_120 {dimension_numbers = #tpu.dot_dimension_numbers<[1], [0], [0], [1], [0, 0, 1, 1], [], []>} : vector<24x64xbf16>, vector<64x32xbf16>, vector<24x32xf32> -> vector<24x32xf32>
    %c1_121 = arith.constant 1 : index
    %c0_122 = arith.constant 0 : index
    %c0_123 = arith.constant 0 : index
    %248 = vector.load %arg15[%c1_121, %c0_122, %c0_123] : memref<2x1x32xf32, #tpu.memory_space<vmem>>, vector<1x1x32xf32>
    %249 = vector.shape_cast %248 : vector<1x1x32xf32> to vector<1x32xf32>
    %250 = vector.broadcast %249 : vector<1x32xf32> to vector<24x32xf32>
    %251 = arith.addf %247, %250 : vector<24x32xf32>
    %252 = arith.addf %251, %233 : vector<24x32xf32>
    %c0_124 = arith.constant 0 : index
    %c0_125 = arith.constant 0 : index
    %c0_126 = arith.constant 0 : index
    %253 = vector.load %arg18[%c0_124, %c0_125, %c0_126] : memref<1x24x32xf32, #tpu.memory_space<vmem>>, vector<1x24x32xf32>
    %254 = vector.shape_cast %253 : vector<1x24x32xf32> to vector<24x32xf32>
    %255 = vector.shape_cast %252 : vector<24x32xf32> to vector<1x24x32xf32>
    tpu.vector_store %arg18[%c0_124, %c0_125, %c0_126], %255 {strides = array<i32>} : memref<1x24x32xf32, #tpu.memory_space<vmem>>, vector<1x24x32xf32>,
    %256 = vector.extract_strided_slice %252 {offsets = [0, 0], sizes = [1, 32], strides = [1, 1]} : vector<24x32xf32> to vector<1x32xf32>
    %257 = arith.truncf %256 : vector<1x32xf32> to vector<1x32xbf16>
    %c0_127 = arith.constant 0 : index
    %c0_128 = arith.constant 0 : index
    %258 = vector.load %arg16[%c0_127, %c0_128] : memref<32x128xbf16, #tpu.memory_space<vmem>>, vector<32x128xbf16>
    %cst_129 = arith.constant dense<0.000000e+00> : vector<1x128xf32>
    %259 = tpu.matmul %257, %258, %cst_129 {dimension_numbers = #tpu.dot_dimension_numbers<[1], [0], [0], [1], [0, 0, 1, 1], [], []>} : vector<1x32xbf16>, vector<32x128xbf16>, vector<1x128xf32> -> vector<1x128xf32>
    %c0_130 = arith.constant 0 : index
    %c0_131 = arith.constant 0 : index
    %260 = vector.load %arg17[%c0_130, %c0_131] : memref<1x128xf32, #tpu.memory_space<vmem>>, vector<1x128xf32>
    %261 = arith.addf %259, %260 : vector<1x128xf32>
    %262 = vector.shape_cast %261 : vector<1x128xf32> to vector<1x128xf32>
    %263 = vector.broadcast %262 : vector<1x128xf32> to vector<8x128xf32>
    %c0_132 = arith.constant 0 : index
    %c0_133 = arith.constant 0 : index
    %c0_134 = arith.constant 0 : index
    %264 = vector.load %arg19[%c0_132, %c0_133, %c0_134] : memref<1x8x128xf32, #tpu.memory_space<vmem>>, vector<1x8x128xf32>
    %265 = vector.shape_cast %264 : vector<1x8x128xf32> to vector<8x128xf32>
    %266 = vector.shape_cast %263 : vector<8x128xf32> to vector<1x8x128xf32>
    tpu.vector_store %arg19[%c0_132, %c0_133, %c0_134], %266 {strides = array<i32>} : memref<1x8x128xf32, #tpu.memory_space<vmem>>, vector<1x8x128xf32>,
    return
  }
  func.func @transform_0(%arg0: i32) -> (i32, i32, i32) {
    %c0_i32 = arith.constant 0 : i32
    %c0_i32_0 = arith.constant 0 : i32
    %c0_i32_1 = arith.constant 0 : i32
    return %arg0, %c0_i32, %c0_i32_0 : i32, i32, i32
  }
  func.func @transform_1(%arg0: i32) -> (i32, i32) {
    %c0_i32 = arith.constant 0 : i32
    %c0_i32_0 = arith.constant 0 : i32
    %c0_i32_1 = arith.constant 0 : i32
    return %c0_i32, %c0_i32_0 : i32, i32
  }
  func.func @transform_2(%arg0: i32) -> (i32, i32) {
    %c0_i32 = arith.constant 0 : i32
    %c0_i32_0 = arith.constant 0 : i32
    %c0_i32_1 = arith.constant 0 : i32
    return %c0_i32, %c0_i32_0 : i32, i32
  }
  func.func @transform_3(%arg0: i32) -> (i32, i32) {
    %c0_i32 = arith.constant 0 : i32
    %c0_i32_0 = arith.constant 0 : i32
    %c0_i32_1 = arith.constant 0 : i32
    return %c0_i32, %c0_i32_0 : i32, i32
  }
  func.func @transform_4(%arg0: i32) -> (i32, i32) {
    %c0_i32 = arith.constant 0 : i32
    %c0_i32_0 = arith.constant 0 : i32
    %c0_i32_1 = arith.constant 0 : i32
    return %c0_i32, %c0_i32_0 : i32, i32
  }
  func.func @transform_5(%arg0: i32) -> (i32, i32, i32) {
    %c0_i32 = arith.constant 0 : i32
    %c0_i32_0 = arith.constant 0 : i32
    %c0_i32_1 = arith.constant 0 : i32
    %c0_i32_2 = arith.constant 0 : i32
    return %c0_i32, %c0_i32_0, %c0_i32_1 : i32, i32, i32
  }
  func.func @transform_6(%arg0: i32) -> (i32, i32, i32) {
    %c0_i32 = arith.constant 0 : i32
    %c0_i32_0 = arith.constant 0 : i32
    %c0_i32_1 = arith.constant 0 : i32
    %c0_i32_2 = arith.constant 0 : i32
    return %c0_i32, %c0_i32_0, %c0_i32_1 : i32, i32, i32
  }
  func.func @transform_7(%arg0: i32) -> (i32, i32, i32) {
    %c0_i32 = arith.constant 0 : i32
    %c0_i32_0 = arith.constant 0 : i32
    %c0_i32_1 = arith.constant 0 : i32
    %c0_i32_2 = arith.constant 0 : i32
    return %c0_i32, %c0_i32_0, %c0_i32_1 : i32, i32, i32
  }
  func.func @transform_8(%arg0: i32) -> (i32, i32, i32) {
    %c0_i32 = arith.constant 0 : i32
    %c0_i32_0 = arith.constant 0 : i32
    %c0_i32_1 = arith.constant 0 : i32
    %c0_i32_2 = arith.constant 0 : i32
    return %c0_i32, %c0_i32_0, %c0_i32_1 : i32, i32, i32
  }
  func.func @transform_9(%arg0: i32) -> (i32, i32, i32) {
    %c0_i32 = arith.constant 0 : i32
    %c0_i32_0 = arith.constant 0 : i32
    %c0_i32_1 = arith.constant 0 : i32
    %c0_i32_2 = arith.constant 0 : i32
    return %c0_i32, %c0_i32_0, %c0_i32_1 : i32, i32, i32
  }
  func.func @transform_10(%arg0: i32) -> (i32, i32, i32) {
    %c0_i32 = arith.constant 0 : i32
    %c0_i32_0 = arith.constant 0 : i32
    %c0_i32_1 = arith.constant 0 : i32
    %c0_i32_2 = arith.constant 0 : i32
    return %c0_i32, %c0_i32_0, %c0_i32_1 : i32, i32, i32
  }
  func.func @transform_11(%arg0: i32) -> (i32, i32, i32) {
    %c0_i32 = arith.constant 0 : i32
    %c0_i32_0 = arith.constant 0 : i32
    %c0_i32_1 = arith.constant 0 : i32
    %c0_i32_2 = arith.constant 0 : i32
    return %c0_i32, %c0_i32_0, %c0_i32_1 : i32, i32, i32
  }
  func.func @transform_12(%arg0: i32) -> (i32, i32, i32) {
    %c0_i32 = arith.constant 0 : i32
    %c0_i32_0 = arith.constant 0 : i32
    %c0_i32_1 = arith.constant 0 : i32
    %c0_i32_2 = arith.constant 0 : i32
    return %c0_i32, %c0_i32_0, %c0_i32_1 : i32, i32, i32
  }
  func.func @transform_13(%arg0: i32) -> (i32, i32, i32) {
    %c0_i32 = arith.constant 0 : i32
    %c0_i32_0 = arith.constant 0 : i32
    %c0_i32_1 = arith.constant 0 : i32
    %c0_i32_2 = arith.constant 0 : i32
    return %c0_i32, %c0_i32_0, %c0_i32_1 : i32, i32, i32
  }
  func.func @transform_14(%arg0: i32) -> (i32, i32, i32) {
    %c0_i32 = arith.constant 0 : i32
    %c0_i32_0 = arith.constant 0 : i32
    %c0_i32_1 = arith.constant 0 : i32
    %c0_i32_2 = arith.constant 0 : i32
    return %c0_i32, %c0_i32_0, %c0_i32_1 : i32, i32, i32
  }
  func.func @transform_15(%arg0: i32) -> (i32, i32) {
    %c0_i32 = arith.constant 0 : i32
    %c0_i32_0 = arith.constant 0 : i32
    %c0_i32_1 = arith.constant 0 : i32
    return %c0_i32, %c0_i32_0 : i32, i32
  }
  func.func @transform_16(%arg0: i32) -> (i32, i32) {
    %c0_i32 = arith.constant 0 : i32
    %c0_i32_0 = arith.constant 0 : i32
    %c0_i32_1 = arith.constant 0 : i32
    return %c0_i32, %c0_i32_0 : i32, i32
  }
  func.func @transform_17(%arg0: i32) -> (i32, i32, i32) {
    %c0_i32 = arith.constant 0 : i32
    %c0_i32_0 = arith.constant 0 : i32
    %c0_i32_1 = arith.constant 0 : i32
    return %arg0, %c0_i32, %c0_i32_0 : i32, i32, i32
  }
  func.func @transform_18(%arg0: i32) -> (i32, i32, i32) {
    %c0_i32 = arith.constant 0 : i32
    %c0_i32_0 = arith.constant 0 : i32
    %c0_i32_1 = arith.constant 0 : i32
    return %arg0, %c0_i32, %c0_i32_0 : i32, i32, i32
  }
}

</mosaic_0001>

<bundles_post_ra>
// kernel: vit_forward.1
= control target key start
LH: loop header
LB: loop body
LE: loop exit
PB: predicated region body
PF: predicated region fallthrough
CT: control target
= control target key end

     0   :  { %s3016_s27 = smov 0   ;;  %s3392_s0 = inlined_call_operand.vmem [shape: f32[2,16,48], index: 0, kind: input, shape index: {}]   ;;  %s3393_s1 = inlined_call_operand.vmem [shape: bf16[48,32], index: 1, kind: input, shape index: {}]   ;;  %s3394_s2 = inlined_call_operand.vmem [shape: f32[1,32], index: 2, kind: input, shape index: {}]   ;;  %s3395_s3 = inlined_call_operand.vmem [shape: f32[1,32], index: 3, kind: input, shape index: {}]   ;;  %s3396_s4 = inlined_call_operand.vmem [shape: f32[24,32], index: 4, kind: input, shape index: {}]   ;;  %s3397_s5 = inlined_call_operand.vmem [shape: f32[2,1,32], index: 5, kind: input, shape index: {}]   ;;  %s3398_s6 = inlined_call_operand.vmem [shape: f32[2,1,32], index: 6, kind: input, shape index: {}]   ;;  %s3399_s7 = inlined_call_operand.vmem [shape: bf16[2,32,96], index: 7, kind: input, shape index: {}]   ;;  %s3400_s8 = inlined_call_operand.vmem [shape: f32[2,1,96], index: 8, kind: input, shape index: {}]   ;;  %s3401_s9 = inlined_call_operand.vmem [shape: bf16[2,32,32], index: 9, kind: input, shape index: {}]   ;;  %s3402_s10 = inlined_call_operand.vmem [shape: f32[2,1,32], index: 10, kind: input, shape index: {}]   ;;  %s3403_s11 = inlined_call_operand.vmem [shape: bf16[2,32,64], index: 11, kind: input, shape index: {}]   ;;  %s3404_s12 = inlined_call_operand.vmem [shape: f32[2,1,64], index: 12, kind: input, shape index: {}]   ;;  %s3405_s13 = inlined_call_operand.vmem [shape: bf16[2,64,32], index: 13, kind: input, shape index: {}]   ;;  %s3406_s14 = inlined_call_operand.vmem [shape: f32[2,1,32], index: 14, kind: input, shape index: {}]   ;;  %s3407_s15 = inlined_call_operand.vmem [shape: bf16[32,128], index: 15, kind: input, shape index: {}]   ;;  %s3408_s16 = inlined_call_operand.vmem [shape: f32[1,128], index: 16, kind: input, shape index: {}]   ;;  %s3409_s17 = inlined_call_operand.vmem [shape: f32[2,24,32], index: 17, kind: output, shape index: {0}]   ;;  %s3410_s18 = inlined_call_operand.vmem [shape: f32[2,8,128], index: 18, kind: output, shape index: {1}]  }
   0x1   :  { %3416 = sst [smem:[#allocation2_spill]] %s3392_s0 }
   0x2   :  { %3417 = sst [smem:[#allocation3_spill]] %s3393_s1 }
   0x3   :  { %3418 = sst [smem:[#allocation4_spill]] %s3394_s2 }
   0x4 LB: > { %s2436_s28 = sadd.s32 4294967295, %s2911_s27   ;;  %p2440_p0 = scmp.ge.s32.totalorder %s2911_s27, 1  ;;  %s2911_s27 = sphi %s3016_s27, %s29_s27  }
   0x5   : > { %p515_p1 = scmp.lt.s32.totalorder %s2911_s27, 3 }
   0x7   : > { %p516_p2 = pnand %p2440_p0, %p515_p1 }
   0x8   : > { %s3419_s0 = sld [smem:[#allocation3_spill]] (!%p516_p2)  ;;  %v2913_v1 = vmov (!%p516_p2), 0.0   ;;  %vm2914_vm0 = vmmov (!%p516_p2), 0   ;;  %p573_p3 = scmp.lt.s32.totalorder (!%p516_p2), %s2436_s28, 1  ;;  %vm622_vm1 = vcmask (!%p516_p2), 392192   ;;  %vm677_vm2 = vcmask (!%p516_p2), 253952  }
   0x9   : > { %519 = sbr.rel (%p516_p2) target bundleno = 5763 (0x1683), region = 88  ;;  %2629 = vmatprep.subr.bf16.mxu0 (!%p516_p2), %v2913_v1  ;;  %2635 = vmatprep.mubr.msk.bf16.mxu0 (!%p516_p2), %vm2914_vm0, %v2913_v1  ;;  %s3420_s24 = sld [smem:[#allocation2_spill]] (!%p516_p2)  ;;  %v674_v7 = vld [vmem:[%s3395_s3] sm:$0x1] (!%p516_p2)  ;;  %v675_v8 = vld [vmem:[%s3396_s4 + $0x10] sm:$0x1] (!%p516_p2) }
   0xa   : > { %v676_v9 = vadd.f32 (!%p516_p2), %v675_v8, %v674_v7  ;;  %vm679_vm3 = vcmask (!%p516_p2), 260096   ;;  %vm671_vm4 = vcmask (!%p516_p2), 261120   ;;  %v667_v14 = vld [vmem:[%s3396_s4] sm:$0xff] (!%p516_p2)  ;;  %v668_v18 = vld [vmem:[%s3396_s4 + $0x8] sm:$0xff] (!%p516_p2)  ;;  %s2915_s30 = smov (!%p516_p2), 96   ;;  %vm839_vm5 = vcmask (!%p516_p2), 130048  }
   0xb   : > { %v2823_v42 = vld [vmem:[%s3399_s7] sm:$0xff] (!%p516_p2)   ;;  %v2824_v43 = vld [vmem:[%s3399_s7 + $0x8] sm:$0xff] (!%p516_p2)   ;;  %vm900_vm7 = vcmask (!%p516_p2), 195584   ;;  %s2917_s19 = smov (!%p516_p2), 64   ;;  %s2918_s1 = smov (!%p516_p2), 112   ;;  %vm947_vm8 = vcmask (!%p516_p2), 1043456  }
   0xc   : > { %2639 = vmatprep.subr.bf16.mxu1 (!%p516_p2), %v2823_v42  ;;  %v2450_v55 = vld [vmem:[%s3397_s5] ss:$0 sm:$0xff] (!%p516_p2)  ;;  %s3414_s20 = smov (!%p516_p2), 80   ;;  %s3412_s23 = smov (!%p516_p2), 48   ;;  %vm1424_vm9 = vcmask (!%p516_p2), 523264  }
   0xd   : > { %2640 = vmatpush3.bf16.msra.mxu1 (!%p516_p2), %v2823_v42  ;;  %v2451_v61 = vld [vmem:[%s3398_s6] ss:$0 sm:$0xff] (!%p516_p2)  ;;  %s3423_s21 = smov (!%p516_p2), 48  }
   0xe   : > { %v2820_v0 = vld [vmem:[%s3419_s0] sm:$0xff] (!%p516_p2)   ;;  %v2821_v2 = vld [vmem:[%s3419_s0 + $0x8] sm:$0xff] (!%p516_p2)   ;;  %v2822_v3 = vld [vmem:[%s3419_s0 + $0x10] sm:$0xff] (!%p516_p2)   ;;  %2641 = vmatprep.subr.bf16.mxu1 (!%p516_p2), %v2824_v43 }
   0xf   : > { %2630 = vmatpush3.bf16.msra.mxu0 (!%p516_p2), %v2820_v0 }
  0x10   : > { %2631 = vmatprep.subr.bf16.mxu0 %v2913_v1  ;;  %s3425_s28 = smov (!%p573_p3, %s2436_s28), 1 }
  0x11   : > { %s2549_s22 = sshll.u32 %s3425_s28, 4  ;;  %s2803_s26 = smul.u32 24, %s3425_s28  ;;  %2642 = vmatpush3.bf16.msra.mxu1 %v2824_v43 }
  0x12   : > { %s577_s25 = scalar_lea.vmem %s3420_s24, %s2549_s22  ;;  %s3421_s24 = sld [smem:[#allocation4_spill]] }
  0x13   : > { %2632 = vmatpush3.bf16.msra.mxu0 %v2821_v2  ;;  %v588_v4 = vld [vmem:[%s577_s25] sm:$0xff]  ;;  %v589_v5 = vld [vmem:[%s577_s25 + $0x8] sm:$0xff]  ;;  %s3054_s22 = scalar_lea.vmem %s3409_s17, %s2803_s26  ;;  %s2444_s29 = sshll.u32 %s3425_s28, 3 }
  0x14   : > { %2633 = vmatprep.subr.bf16.mxu0 %v2913_v1  ;;  %v590_v6 = vpack.c.bf16 %v589_v5, %v588_v4  ;;  %678 = vst.msk [vmem:[%s3054_s22 + $0x10] sm:$0x1] %vm677_vm2, %v676_v9 }
  0x15   : > { %680 = vst.msk [vmem:[%s3054_s22 + $0x11] sm:$0x7f] %vm679_vm3, %v2913_v1 }
  0x17   : > { %2634 = vmatpush3.bf16.msra.mxu0 %v2822_v3 }
  0x18   : > { %v2445_v12 = vld [vmem:[%s3421_s24] ss:$0 sm:$0xff] }
  0x1a   : > { %2636 = vmatmul.mubr.msk.bf16.vlgmr.msra.gmra.mrb[0].mxu0 %vm622_vm1, %v590_v6  ;;  %v2452_v6 = vld [vmem:[%s3400_s8] ss:$0 sm:$0xff] }
  0x1c   : > { %v3060_v10 = vld [vmem:[%s3054_s22 + $0x10] sm:$0xff] }
  0x1d   : > { %v696_v11 = vsel %vm671_vm4, %v3060_v10, 0.0 }
  0x1e   : > { %697 = vadd.xlane.f32.xlu1 %v696_v11 }
  0xab   : > { %v698_v27 = vpop.xlane.xlu1 %697 }
  0xac   : > { %v702_v28 = vmul.f32 0.03125, %v698_v27 }
  0xae   : > { %v705_v31 = vsub.f32 %v3060_v10, %v702_v28 }
  0xb0   : > { %v708_v36 = vmul.f32 %v705_v31, %v705_v31 }
  0xb2   : > { %v715_v39 = vsel %vm671_vm4, %v708_v36, 0.0 }
  0xed   : > { %v660_v13 = vpop.f32.mrb[0].mxu0 }
  0xee   : > { %v661_v15 = vadd.f32 %v2445_v12, %v660_v13  ;;  %v2637_v16 = vpop.f32.mrb[1].mxu0 }
  0xef   : > { %v663_v17 = vpop.f32.mrb[2].mxu0 }
  0xf0   : > { %v669_v19 = vadd.f32 %v667_v14, %v661_v15  ;;  %v664_v20 = vadd.f32 %v2445_v12, %v663_v17  ;;  %v2638_v21 = vpop.f32.mrb[3].mxu0 }
  0xf1   : > { %v684_v21 = vlaneseq }
  0xf2   : > { %672 = vst.msk [vmem:[%s3054_s22] sm:$0xff] %vm671_vm4, %v669_v19  ;;  %v670_v22 = vadd.f32 %v668_v18, %v664_v20 }
  0xf4   : > { %673 = vst.msk [vmem:[%s3054_s22 + $0x8] sm:$0xff] %vm671_vm4, %v670_v22  ;;  %v685_v22 = vand.u32 127, %v684_v21 }
  0xf6   : > { %vm686_vm6 = vcmp.lt.s32.totalorder %v685_v22, 17 }
  0xf9   : > { %v3078_v23 = vld [vmem:[%s3054_s22] sm:$0xff] }
  0xfa   : > { %v690_v24 = vsel %vm671_vm4, %v3078_v23, 0.0 }
  0xfb   : > { %691 = vadd.xlane.f32.xlu0 %v690_v24  ;;  %v3083_v25 = vld [vmem:[%s3054_s22 + $0x8] sm:$0xff]  ;;  %v2916_v24 = vmov -1e+30  }
  0xfc   : > { %v693_v26 = vsel %vm671_vm4, %v3083_v25, 0.0 }
  0xff   : > { %694 = vadd.xlane.f32.xlu0 %v693_v26  ;;  %v3127_v26 = vsel %vm686_vm6, 0.0, %v2916_v24 }
 0x188   : > { %v692_v29 = vpop.xlane.xlu0 %691 }
 0x189   : > { %v700_v30 = vmul.f32 0.03125, %v692_v29 }
 0x18b   : > { %v703_v32 = vsub.f32 %v3078_v23, %v700_v30 }
 0x18c   : > { %v695_v33 = vpop.xlane.xlu0 %694 }
 0x18d   : > { %v701_v34 = vmul.f32 0.03125, %v695_v33  ;;  %v706_v35 = vmul.f32 %v703_v32, %v703_v32 }
 0x18f   : > { %v704_v37 = vsub.f32 %v3083_v25, %v701_v34  ;;  %v709_v38 = vsel %vm671_vm4, %v706_v35, 0.0 }
 0x190   : > { %710 = vadd.xlane.f32.xlu1 %v709_v38 }
 0x191   : > { %v707_v40 = vmul.f32 %v704_v37, %v704_v37 }
 0x193   : > { %v712_v41 = vsel %vm671_vm4, %v707_v40, 0.0 }
 0x194   : > { %716 = vadd.xlane.f32.xlu1 %v715_v39  ;;  %713 = vadd.xlane.f32.xlu0 %v712_v41 }
 0x21d   : > { %v711_v44 = vpop.xlane.xlu1 %710 }
 0x21e   : > { %v718_v45 = vmul.f32 0.03125, %v711_v44 }
 0x220   : > { %v721_v46 = vadd.f32 1e-05, %v718_v45 }
 0x221   : > { %v717_v47 = vpop.xlane.xlu1 %716  ;;  %v714_v48 = vpop.xlane.xlu0 %713 }
 0x222   : > { %2845 = vrsqrt.f32 %v721_v46  ;;  %v720_v49 = vmul.f32 0.03125, %v717_v47  ;;  %v719_v50 = vmul.f32 0.03125, %v714_v48 }
 0x224   : > { %v723_v51 = vadd.f32 1e-05, %v720_v49  ;;  %v722_v52 = vadd.f32 1e-05, %v719_v50 }
 0x226   : > { %2847 = vrsqrt.f32 %v723_v51 }
 0x227   : > { %2849 = vrsqrt.f32 %v722_v52 }
 0x22c   : > { %v2846_v53 = vpop.eup %2845 }
 0x22d   : > { %v727_v54 = vmul.f32 %v2846_v53, %v703_v32 }
 0x22f   : > { %v736_v60 = vmul.f32 %v2450_v55, %v727_v54 }
 0x230   : > { %v2848_v56 = vpop.eup %2847 }
 0x231   : > { %v2850_v57 = vpop.eup %2849  ;;  %v729_v58 = vmul.f32 %v2848_v56, %v705_v31  ;;  %v745_v2 = vadd.f32 %v2451_v61, %v736_v60 }
 0x232   : > { %v728_v59 = vmul.f32 %v2850_v57, %v704_v37 }
 0x233   : > { %v738_v62 = vmul.f32 %v2450_v55, %v729_v58 }
 0x234   : > { %v737_v63 = vmul.f32 %v2450_v55, %v728_v59 }
 0x235   : > { %v747_v0 = vadd.f32 %v2451_v61, %v738_v62 }
 0x236   : > { %v746_v3 = vadd.f32 %v2451_v61, %v737_v63 }
 0x237   : > { %v749_v4 = vpack.c.bf16 %v747_v0, %v747_v0 }
 0x238   : > { %v748_v5 = vpack.c.bf16 %v746_v3, %v745_v2 }
 0x23a   : > { %2643 = vmatprep.mubr.msk.bf16.mxu1 %vm671_vm4, %v748_v5 }
 0x23b   : > { %2644 = vmatmul.mubr.msk.bf16.vlgmr.msra.gmra.mrb[0].mxu1 %vm671_vm4, %v749_v4 }
 0x30e   : > { %v2645_v7 = vpop.f32.mrb[0].mxu1 }
 0x30f   : > { %v822_v8 = vadd.f32 %v2645_v7, %v2452_v6  ;;  %v813_v9 = vpop.f32.mrb[1].mxu1 }
 0x310   : > { %v2646_v11 = vpop.f32.mrb[2].mxu1  ;;  %v814_v14 = vadd.f32 %v2452_v6, %v813_v9  ;;  %v2825_v9 = vld [vmem:[%s3401_s9] sm:$0xff]  }
 0x311   : > { %v3110_v12 = vpack.c.bf16 %v822_v8, %v822_v8  ;;  %v816_v13 = vpop.f32.mrb[3].mxu1 }
 0x312   : > { %v817_v15 = vadd.f32 %v2452_v6, %v816_v13 }
 0x313   : > { %837 = vrot.lane.b32.xlu1 %v3110_v12, %s2915_s30 }
 0x314   : > { %v3114_v16 = vpack.c.bf16 %v817_v15, %v814_v14 }
 0x316   : > { %835 = vrot.lane.b32.xlu0 %v3114_v16, %s2915_s30  ;;  %2651 = vmatprep.mubr.msk.bf16.mxu1 %vm839_vm5, %v3114_v16 }
 0x385   : > { %v838_v19 = vpop.permute.xlu1 %837 }
 0x386   : > { %v850_v20 = vsel %vm839_vm5, %v838_v19, 0 }
 0x388   : > { %v836_v17 = vpop.permute.xlu0 %835 }
 0x389   : > { %v847_v18 = vsel %vm839_vm5, %v836_v17, 0  ;;  %2791 = vmatprep.subr.msk.bf16.mxu1 %vm839_vm5, %v836_v17 }
 0x38a   : > { %2648 = vmatpush3.bf16.xpose.msra.mxu1 %v847_v18 }
 0x38b   : > { %2792 = vmatprep.subr.msk.bf16.mxu1 %vm839_vm5, %v838_v19 }
 0x392   : > { %2650 = vmatpush3.bf16.xpose.msra.mxu1 %v850_v20 }
 0x399   : > { %2652 = vmatmul.mubr.msk.bf16.vlgmr.msra.gmra.mrb[4].mxu1 %vm839_vm5, %v3110_v12 }
 0x46c   : > { %v2653_v27 = vpop.f32.mrb[4].mxu1 }
 0x46d   : > { %v886_v28 = vpop.f32.mrb[5].mxu1  ;;  %v895_v34 = vadd.f32 %v2653_v27, %v3127_v26 }
 0x46e   : > { %v887_v29 = vadd.f32 %v886_v28, %v3127_v26  ;;  %v2654_v30 = vpop.f32.mrb[6].mxu1 }
 0x46f   : > { %v889_v31 = vpop.f32.mrb[7].mxu1  ;;  %v907_v36 = vsel %vm900_vm7, %v895_v34, -inf }
 0x470   : > { %v890_v32 = vadd.f32 %v889_v31, %v3127_v26  ;;  %v901_v33 = vsel %vm900_vm7, %v887_v29, -inf }
 0x471   : > { %902 = vmax.xlane.f32.xlu1 %v901_v33 }
 0x472   : > { %v904_v35 = vsel %vm900_vm7, %v890_v32, -inf }
 0x473   : > { %905 = vmax.xlane.f32.xlu0 %v904_v35 }
 0x477   : > { %908 = vmax.xlane.f32.xlu0 %v907_v36 }
 0x4fe   : > { %v903_v37 = vpop.xlane.xlu1 %902 }
 0x4ff   : > { %v910_v40 = vsub.f32 %v887_v29, %v903_v37 }
 0x500   : > { %v906_v38 = vpop.xlane.xlu0 %905 }
 0x501   : > { %v911_v39 = vsub.f32 %v890_v32, %v906_v38  ;;  %v913_v44 = vmul.f32 1.442695, %v910_v40 }
 0x503   : > { %v915_v41 = vmul.f32 1.442695, %v911_v39 }
 0x504   : > { %v909_v42 = vpop.xlane.xlu0 %908 }
 0x505   : > { %2851 = vpow2.f32 %v915_v41  ;;  %v912_v43 = vsub.f32 %v895_v34, %v909_v42 }
 0x507   : > { %v917_v45 = vmul.f32 1.442695, %v912_v43 }
 0x509   : > { %2853 = vpow2.f32 %v917_v45 }
 0x50a   : > { %2855 = vpow2.f32 %v913_v44 }
 0x50f   : > { %v2852_v46 = vpop.eup %2851 }
 0x510   : > { %v922_v47 = vsel %vm900_vm7, %v2852_v46, 0.0 }
 0x511   : > { %923 = vadd.xlane.f32.xlu0 %v922_v47 }
 0x513   : > { %v2854_v48 = vpop.eup %2853 }
 0x514   : > { %v925_v49 = vsel %vm900_vm7, %v2854_v48, 0.0  ;;  %v2856_v50 = vpop.eup %2855 }
 0x515   : > { %926 = vadd.xlane.f32.xlu1 %v925_v49  ;;  %v919_v51 = vsel %vm900_vm7, %v2856_v50, 0.0 }
 0x519   : > { %920 = vadd.xlane.f32.xlu1 %v919_v51 }
 0x527   : > { %936 = vrot.lane.b32.xlu0 %v3114_v16, %s2917_s19 }
 0x52a   : > { %938 = vrot.lane.b32.xlu1 %v3110_v12, %s2917_s19 }
 0x52b   : > { %1001 = vrot.lane.b32.xlu0 %v3114_v16, %s2918_s1 }
 0x52e   : > { %1005 = vrot.lane.b32.xlu1 %v3114_v16, %s3414_s20 }
 0x532   : > { %1007 = vrot.lane.b32.xlu1 %v3110_v12, %s3414_s20 }
 0x536   : > { %1003 = vrot.lane.b32.xlu1 %v3110_v12, %s2918_s1 }
 0x59e   : > { %v924_v52 = vpop.xlane.xlu0 %923 }
 0x5a2   : > { %v937_v53 = vpop.permute.xlu0 %936  ;;  %v927_v54 = vpop.xlane.xlu1 %926 }
 0x5a3   : > { %2655 = vmatprep.subr.bf16.mxu0 %v937_v53  ;;  %2857 = vrcp.f32 %v927_v54 }
 0x5a4   : > { %2656 = vmatpush3.bf16.msra.mxu0 %v937_v53  ;;  %2859 = vrcp.f32 %v924_v52 }
 0x5a6   : > { %v921_v55 = vpop.xlane.xlu1 %920  ;;  %v1002_v4 = vpop.permute.xlu0 %1001 }
 0x5a7   : > { %2861 = vrcp.f32 %v921_v55 }
 0x5aa   : > { %v939_v56 = vpop.permute.xlu1 %938 }
 0x5ab   : > { %v949_v57 = vsel %vm947_vm8, %v939_v56, 0  ;;  %2793 = vmatprep.subr.msk.bf16.mxu0 %vm947_vm8, %v939_v56 }
 0x5ac   : > { %2658 = vmatpush3.bf16.msra.mxu0 %v949_v57 }
 0x5ad   : > { %v2858_v58 = vpop.eup %2857 }
 0x5ae   : > { %v1006_v59 = vpop.permute.xlu1 %1005  ;;  %v2860_v60 = vpop.eup %2859  ;;  %v933_v62 = vmul.f32 %v2858_v58, %v2854_v48 }
 0x5af   : > { %2794 = vmatprep.subr.msk.bf16.mxu0 %vm839_vm5, %v1006_v59  ;;  %v932_v0 = vmul.f32 %v2860_v60, %v2852_v46  ;;  %v1016_v5 = vsel %vm839_vm5, %v1006_v59, 0 }
 0x5b0   : > { %v935_v3 = vpack.c.bf16 %v933_v62, %v933_v62 }
 0x5b1   : > { %v2862_v61 = vpop.eup %2861 }
 0x5b2   : > { %v931_v63 = vmul.f32 %v2862_v61, %v2856_v50  ;;  %v1008_v6 = vpop.permute.xlu1 %1007 }
 0x5b3   : > { %v1019_v7 = vsel %vm839_vm5, %v1008_v6, 0 }
 0x5b4   : > { %v934_v2 = vpack.c.bf16 %v932_v0, %v931_v63 }
 0x5b6   : > { %2659 = vmatprep.mubr.msk.bf16.mxu0 %vm900_vm7, %v934_v2  ;;  %v1004_v8 = vpop.permute.xlu1 %1003 }
 0x5b7   : > { %2660 = vmatmul.mubr.msk.bf16.vlgmr.msra.gmra.mrb[4].mxu0 %vm900_vm7, %v935_v3 }
 0x5b8   : > { %2664 = vmatpush3.bf16.xpose.msra.mxu0 %v1016_v5  ;;  %2667 = vmatprep.mubr.msk.bf16.mxu0 %vm839_vm5, %v1002_v4 }
 0x5b9   : > { %2795 = vmatprep.subr.msk.bf16.mxu0 %vm839_vm5, %v1008_v6 }
 0x5c0   : > { %2666 = vmatpush3.bf16.xpose.msra.mxu0 %v1019_v7 }
 0x5c1   : > { %2685 = vmatprep.subr.bf16.mxu0 %v2825_v9 }
 0x5c7   : > { %2668 = vmatmul.mubr.msk.bf16.vlgmr.msra.gmra.mrb[8].mxu0 %vm839_vm5, %v1004_v8  ;;  %v2827_v8 = vld [vmem:[%s3403_s11] sm:$0xff]  }
 0x5c8   : > { %2686 = vmatpush3.bf16.msra.mxu0 %v2825_v9  ;;  %v2828_v9 = vld [vmem:[%s3403_s11 + $0x8] sm:$0xff]  }
 0x68a   : > { %v2661_v11 = vpop.f32.mrb[4].mxu0 }
 0x68b   : > { %v985_v13 = vpop.f32.mrb[5].mxu0  ;;  %v1000_v18 = vpack.c.bf16 %v2661_v11, %v2661_v11  ;;  %v2829_v11 = vld [vmem:[%s3405_s13] sm:$0xff]  }
 0x68c   : > { %v2662_v14 = vpop.f32.mrb[6].mxu0  ;;  %2699 = vmatprep.subr.bf16.mxu0 %v2829_v11 }
 0x68d   : > { %v988_v15 = vpop.f32.mrb[7].mxu0 }
 0x68e   : > { %v999_v17 = vpack.c.bf16 %v988_v15, %v985_v13  ;;  %v2830_v13 = vld [vmem:[%s3405_s13 + $0x8] sm:$0xff]   ;;  %v2471_v15 = vld [vmem:[%s3402_s10] ss:$0 sm:$0xff] }
 0x690   : > { %2687 = vmatprep.mubr.msk.bf16.mxu0 %vm839_vm5, %v999_v17 }
 0x691   : > { %2688 = vmatmul.mubr.msk.bf16.vlgmr.msra.gmra.mrb[12].mxu0 %vm839_vm5, %v1000_v18 }
 0x692   : > { %2700 = vmatpush3.bf16.msra.mxu0 %v2829_v11 }
 0x693   : > { %2701 = vmatprep.subr.bf16.mxu0 %v2830_v13 }
 0x696   : > { %2702 = vmatpush3.bf16.msra.mxu0 %v2830_v13  ;;  %v2833_v13 = vld [vmem:[%s3399_s7 + $0x10] sm:$0xff]  }
 0x69a   : > { %v2669_v19 = vpop.f32.mrb[8].mxu0 }
 0x69b   : > { %v1055_v20 = vpop.f32.mrb[9].mxu0  ;;  %v1064_v28 = vadd.f32 %v2669_v19, %v3127_v26 }
 0x69c   : > { %v1056_v22 = vadd.f32 %v1055_v20, %v3127_v26  ;;  %v2670_v24 = vpop.f32.mrb[10].mxu0 }
 0x69d   : > { %v1058_v27 = vpop.f32.mrb[11].mxu0  ;;  %v1075_v32 = vsel %vm900_vm7, %v1064_v28, -inf }
 0x69e   : > { %v1059_v29 = vadd.f32 %v1058_v27, %v3127_v26  ;;  %v1069_v30 = vsel %vm900_vm7, %v1056_v22, -inf }
 0x69f   : > { %1070 = vmax.xlane.f32.xlu0 %v1069_v30 }
 0x6a0   : > { %v1072_v31 = vsel %vm900_vm7, %v1059_v29, -inf }
 0x6a1   : > { %1073 = vmax.xlane.f32.xlu1 %v1072_v31 }
 0x6a3   : > { %1076 = vmax.xlane.f32.xlu0 %v1075_v32 }
 0x72c   : > { %v1071_v33 = vpop.xlane.xlu0 %1070 }
 0x72d   : > { %v1078_v34 = vsub.f32 %v1056_v22, %v1071_v33 }
 0x72e   : > { %v1074_v35 = vpop.xlane.xlu1 %1073 }
 0x72f   : > { %v1081_v36 = vmul.f32 1.442695, %v1078_v34  ;;  %v1079_v37 = vsub.f32 %v1059_v29, %v1074_v35  ;;  %v2831_v35 = vld [vmem:[%s3405_s13 + $0x10] sm:$0xff]  }
 0x730   : > { %v1077_v38 = vpop.xlane.xlu0 %1076  ;;  %2703 = vmatprep.subr.bf16.mxu0 %v2831_v35 }
 0x731   : > { %2863 = vpow2.f32 %v1081_v36  ;;  %v1083_v39 = vmul.f32 1.442695, %v1079_v37  ;;  %v1080_v40 = vsub.f32 %v1064_v28, %v1077_v38  ;;  %2704 = vmatpush3.bf16.msra.mxu0 %v2831_v35  ;;  %v2487_v35 = vld [vmem:[%s3398_s6 + $0x1] ss:$0 sm:$0xff] }
 0x733   : > { %2865 = vpow2.f32 %v1083_v39  ;;  %v1085_v41 = vmul.f32 1.442695, %v1080_v40 }
 0x735   : > { %2867 = vpow2.f32 %v1085_v41 }
 0x73b   : > { %v2864_v42 = vpop.eup %2863 }
 0x73c   : > { %v1087_v43 = vsel %vm900_vm7, %v2864_v42, 0.0 }
 0x73d   : > { %v2866_v44 = vpop.eup %2865  ;;  %1088 = vadd.xlane.f32.xlu0 %v1087_v43 }
 0x73e   : > { %v1090_v46 = vsel %vm900_vm7, %v2866_v44, 0.0 }
 0x73f   : > { %v2868_v45 = vpop.eup %2867 }
 0x740   : > { %v1093_v47 = vsel %vm900_vm7, %v2868_v45, 0.0 }
 0x741   : > { %1091 = vadd.xlane.f32.xlu0 %v1090_v46  ;;  %1094 = vadd.xlane.f32.xlu1 %v1093_v47  ;;  %v2477_v47 = vld [vmem:[%s3406_s14] ss:$0 sm:$0xff] }
 0x752   : > { %1106 = vrot.lane.b32.xlu1 %v3110_v12, %s3412_s23  ;;  %v2826_v12 = vld [vmem:[%s3401_s9 + $0x8] sm:$0xff]  }
 0x757   : > { %1104 = vrot.lane.b32.xlu0 %v3114_v16, %s3412_s23 }
 0x764   : > { %v2689_v48 = vpop.f32.mrb[12].mxu0 }
 0x765   : > { %v1274_v49 = vpop.f32.mrb[13].mxu0 }
 0x766   : > { %v2690_v50 = vpop.f32.mrb[14].mxu0 }
 0x767   : > { %v1277_v51 = vpop.f32.mrb[15].mxu0 }
 0x7ca   : > { %v1089_v52 = vpop.xlane.xlu0 %1088 }
 0x7cb   : > { %2869 = vrcp.f32 %v1089_v52 }
 0x7ce   : > { %v1095_v53 = vpop.xlane.xlu1 %1094  ;;  %v1092_v54 = vpop.xlane.xlu0 %1091 }
 0x7cf   : > { %2871 = vrcp.f32 %v1095_v53 }
 0x7d0   : > { %2873 = vrcp.f32 %v1092_v54 }
 0x7d2   : > { %v1105_v55 = vpop.permute.xlu0 %1104  ;;  %v1107_v56 = vpop.permute.xlu1 %1106 }
 0x7d3   : > { %2671 = vmatprep.subr.bf16.mxu1 %v1105_v55  ;;  %v1116_v16 = vsel %vm947_vm8, %v1107_v56, 0 }
 0x7d4   : > { %2672 = vmatpush3.bf16.msra.mxu1 %v1105_v55 }
 0x7d5   : > { %2796 = vmatprep.subr.msk.bf16.mxu1 %vm947_vm8, %v1107_v56  ;;  %v2870_v57 = vpop.eup %2869 }
 0x7d6   : > { %v1099_v61 = vmul.f32 %v2870_v57, %v2864_v42 }
 0x7d8   : > { %2674 = vmatpush3.bf16.msra.mxu1 %v1116_v16 }
 0x7d9   : > { %v2872_v58 = vpop.eup %2871  ;;  %2679 = vmatprep.subr.bf16.mxu1 %v2826_v12 }
 0x7da   : > { %v2874_v59 = vpop.eup %2873  ;;  %v1101_v60 = vmul.f32 %v2872_v58, %v2868_v45 }
 0x7db   : > { %v1100_v62 = vmul.f32 %v2874_v59, %v2866_v44 }
 0x7dc   : > { %v1103_v63 = vpack.c.bf16 %v1101_v60, %v1101_v60 }
 0x7dd   : > { %v1102_v0 = vpack.c.bf16 %v1100_v62, %v1099_v61 }
 0x7df   : > { %2675 = vmatprep.mubr.msk.bf16.mxu1 %vm900_vm7, %v1102_v0 }
 0x7e0   : > { %2676 = vmatmul.mubr.msk.bf16.vlgmr.msra.gmra.mrb[8].mxu1 %vm900_vm7, %v1103_v63 }
 0x7e1   : > { %2680 = vmatpush3.bf16.msra.mxu1 %v2826_v12 }
 0x7e2   : > { %2691 = vmatprep.subr.bf16.mxu1 %v2827_v8 }
 0x8b3   : > { %v2677_v2 = vpop.f32.mrb[8].mxu1 }
 0x8b4   : > { %v1152_v3 = vpop.f32.mrb[9].mxu1  ;;  %v1167_v7 = vpack.c.bf16 %v2677_v2, %v2677_v2 }
 0x8b5   : > { %v2678_v4 = vpop.f32.mrb[10].mxu1 }
 0x8b6   : > { %v1155_v5 = vpop.f32.mrb[11].mxu1 }
 0x8b7   : > { %v1166_v6 = vpack.c.bf16 %v1155_v5, %v1152_v3 }
 0x8b9   : > { %2681 = vmatprep.mubr.msk.bf16.mxu1 %vm839_vm5, %v1166_v6 }
 0x8ba   : > { %2682 = vmatmul.mubr.msk.bf16.vlgmr.msra.gmra.mrb[12].mxu1 %vm839_vm5, %v1167_v7 }
 0x8bb   : > { %2692 = vmatpush3.bf16.msra.mxu1 %v2827_v8 }
 0x8bc   : > { %2693 = vmatprep.subr.bf16.mxu1 %v2828_v9 }
 0x8bf   : > { %2694 = vmatpush3.bf16.msra.mxu1 %v2828_v9 }
 0x8c0   : > { %2711 = vmatprep.subr.bf16.mxu1 %v2833_v13 }
 0x98d   : > { %v2683_v14 = vpop.f32.mrb[12].mxu1 }
 0x98e   : > { %v1283_v17 = vadd.f32 %v2689_v48, %v2683_v14  ;;  %v1214_v18 = vpop.f32.mrb[13].mxu1  ;;  %v2834_v14 = vld [vmem:[%s3399_s7 + $0x18] sm:$0xff]  }
 0x98f   : > { %v1275_v19 = vadd.f32 %v1274_v49, %v1214_v18  ;;  %v2684_v20 = vpop.f32.mrb[14].mxu1 }
 0x990   : > { %v1297_v22 = vadd.f32 %v2471_v15, %v1283_v17  ;;  %v1217_v24 = vpop.f32.mrb[15].mxu1 }
 0x991   : > { %v1295_v27 = vadd.f32 %v2471_v15, %v1275_v19  ;;  %v1278_v28 = vadd.f32 %v1277_v51, %v1217_v24 }
 0x992   : > { %v1300_v30 = vadd.f32 %v1297_v22, %v3060_v10  ;;  %v2832_v10 = vld [vmem:[%s3405_s13 + $0x18] sm:$0xff]  }
 0x993   : > { %v1296_v29 = vadd.f32 %v2471_v15, %v1278_v28  ;;  %v1298_v31 = vadd.f32 %v1295_v27, %v3078_v23  ;;  %2705 = vmatprep.subr.bf16.mxu0 %v2832_v10  ;;  %v2472_v23 = vld [vmem:[%s3404_s12] ss:$0 sm:$0xff] }
 0x994   : > { %v1302_v34 = vpack.c.bf16 %v1300_v30, %v1300_v30  ;;  %2706 = vmatpush3.bf16.msra.mxu0 %v2832_v10 }
 0x995   : > { %v1299_v32 = vadd.f32 %v1296_v29, %v3083_v25 }
 0x997   : > { %v1301_v33 = vpack.c.bf16 %v1299_v32, %v1298_v31 }
 0x999   : > { %2695 = vmatprep.mubr.msk.bf16.mxu1 %vm671_vm4, %v1301_v33 }
 0x99a   : > { %2696 = vmatmul.mubr.msk.bf16.vlgmr.msra.gmra.mrb[16].mxu1 %vm671_vm4, %v1302_v34 }
 0x99b   : > { %2712 = vmatpush3.bf16.msra.mxu1 %v2833_v13 }
 0x99c   : > { %2713 = vmatprep.subr.bf16.mxu1 %v2834_v14 }
 0x99f   : > { %2714 = vmatpush3.bf16.msra.mxu1 %v2834_v14 }
 0xa6d   : > { %v2697_v25 = vpop.f32.mrb[16].mxu1 }
 0xa6e   : > { %v1375_v36 = vadd.f32 %v2697_v25, %v2472_v23  ;;  %v1366_v37 = vpop.f32.mrb[17].mxu1 }
 0xa6f   : > { %v1367_v38 = vadd.f32 %v2472_v23, %v1366_v37  ;;  %v2698_v39 = vpop.f32.mrb[18].mxu1 }
 0xa70   : > { %v1369_v40 = vpop.f32.mrb[19].mxu1  ;;  %v1382_v42 = vmax.f32 %v1375_v36, 0.0 }
 0xa71   : > { %v1370_v41 = vadd.f32 %v2472_v23, %v1369_v40  ;;  %v1380_v43 = vmax.f32 %v1367_v38, 0.0 }
 0xa72   : > { %v1384_v46 = vpack.c.bf16 %v1382_v42, %v1382_v42  ;;  %v2493_v42 = vld [vmem:[%s3400_s8 + $0x1] ss:$0 sm:$0xff] }
 0xa73   : > { %v1381_v44 = vmax.f32 %v1370_v41, 0.0 }
 0xa75   : > { %v1383_v45 = vpack.c.bf16 %v1381_v44, %v1380_v43 }
 0xa77   : > { %2707 = vmatprep.mubr.msk.bf16.mxu0 %vm1424_vm9, %v1383_v45 }
 0xa78   : > { %2708 = vmatmul.mubr.msk.bf16.vlgmr.msra.gmra.mrb[16].mxu0 %vm1424_vm9, %v1384_v46 }
 0xb4b   : > { %v2709_v48 = vpop.f32.mrb[16].mxu0 }
 0xb4c   : > { %v1465_v49 = vpop.f32.mrb[17].mxu0  ;;  %v1474_v53 = vadd.f32 %v2709_v48, %v2477_v47 }
 0xb4d   : > { %v1466_v50 = vadd.f32 %v2477_v47, %v1465_v49  ;;  %v2710_v51 = vpop.f32.mrb[18].mxu0 }
 0xb4e   : > { %v1468_v52 = vpop.f32.mrb[19].mxu0  ;;  %v3227_v16 = vadd.f32 %v1474_v53, %v1300_v30  ;;  %v2486_v30 = vld [vmem:[%s3397_s5 + $0x1] ss:$0 sm:$0xff] }
 0xb4f   : > { %v3221_v54 = vadd.f32 %v1466_v50, %v1298_v31  ;;  %v1469_v55 = vadd.f32 %v2477_v47, %v1468_v52 }
 0xb50   : > { %v1492_v58 = vsel %vm671_vm4, %v3227_v16, 0.0 }
 0xb51   : > { %v3223_v56 = vadd.f32 %v1469_v55, %v1299_v32  ;;  %v1486_v12 = vsel %vm671_vm4, %v3221_v54, 0.0 }
 0xb52   : > { %1487 = vadd.xlane.f32.xlu1 %v1486_v12 }
 0xb53   : > { %v1489_v57 = vsel %vm671_vm4, %v3223_v56, 0.0 }
 0xb54   : > { %1490 = vadd.xlane.f32.xlu0 %v1489_v57 }
 0xb58   : > { %1493 = vadd.xlane.f32.xlu0 %v1492_v58 }
 0xbdf   : > { %v1488_v59 = vpop.xlane.xlu1 %1487 }
 0xbe0   : > { %v1495_v60 = vmul.f32 0.03125, %v1488_v59 }
 0xbe1   : > { %v1491_v61 = vpop.xlane.xlu0 %1490 }
 0xbe2   : > { %v1498_v62 = vsub.f32 %v3221_v54, %v1495_v60  ;;  %v1496_v63 = vmul.f32 0.03125, %v1491_v61 }
 0xbe4   : > { %v1499_v0 = vsub.f32 %v3223_v56, %v1496_v63  ;;  %v1501_v2 = vmul.f32 %v1498_v62, %v1498_v62 }
 0xbe5   : > { %v1494_v3 = vpop.xlane.xlu0 %1493 }
 0xbe6   : > { %v1497_v4 = vmul.f32 0.03125, %v1494_v3  ;;  %v1504_v5 = vsel %vm671_vm4, %v1501_v2, 0.0  ;;  %v1502_v6 = vmul.f32 %v1499_v0, %v1499_v0 }
 0xbe7   : > { %1505 = vadd.xlane.f32.xlu1 %v1504_v5 }
 0xbe8   : > { %v1500_v7 = vsub.f32 %v3227_v16, %v1497_v4  ;;  %v1507_v8 = vsel %vm671_vm4, %v1502_v6, 0.0 }
 0xbe9   : > { %1508 = vadd.xlane.f32.xlu0 %v1507_v8 }
 0xbea   : > { %v1503_v9 = vmul.f32 %v1500_v7, %v1500_v7 }
 0xbec   : > { %v1510_v11 = vsel %vm671_vm4, %v1503_v9, 0.0 }
 0xbed   : > { %1511 = vadd.xlane.f32.xlu1 %v1510_v11 }
 0xc74   : > { %v1506_v15 = vpop.xlane.xlu1 %1505 }
 0xc75   : > { %v1513_v17 = vmul.f32 0.03125, %v1506_v15 }
 0xc76   : > { %v1509_v18 = vpop.xlane.xlu0 %1508 }
 0xc77   : > { %v1516_v19 = vadd.f32 1e-05, %v1513_v17  ;;  %v1514_v20 = vmul.f32 0.03125, %v1509_v18 }
 0xc79   : > { %2875 = vrsqrt.f32 %v1516_v19  ;;  %v1517_v22 = vadd.f32 1e-05, %v1514_v20 }
 0xc7a   : > { %v1512_v24 = vpop.xlane.xlu1 %1511 }
 0xc7b   : > { %2877 = vrsqrt.f32 %v1517_v22  ;;  %v1515_v27 = vmul.f32 0.03125, %v1512_v24 }
 0xc7d   : > { %v1518_v28 = vadd.f32 1e-05, %v1515_v27 }
 0xc7f   : > { %2879 = vrsqrt.f32 %v1518_v28 }
 0xc83   : > { %v2876_v29 = vpop.eup %2875 }
 0xc84   : > { %v1522_v31 = vmul.f32 %v2876_v29, %v1498_v62 }
 0xc85   : > { %v2878_v32 = vpop.eup %2877 }
 0xc86   : > { %v1523_v33 = vmul.f32 %v2878_v32, %v1499_v0  ;;  %v1531_v34 = vmul.f32 %v2486_v30, %v1522_v31 }
 0xc88   : > { %v1532_v10 = vmul.f32 %v2486_v30, %v1523_v33  ;;  %v1540_v36 = vadd.f32 %v2487_v35, %v1531_v34 }
 0xc89   : > { %v2880_v23 = vpop.eup %2879 }
 0xc8a   : > { %v1524_v25 = vmul.f32 %v2880_v23, %v1500_v7  ;;  %v1541_v37 = vadd.f32 %v2487_v35, %v1532_v10 }
 0xc8c   : > { %v1543_v38 = vpack.c.bf16 %v1541_v37, %v1540_v36  ;;  %v1533_v39 = vmul.f32 %v2486_v30, %v1524_v25 }
 0xc8e   : > { %2715 = vmatprep.mubr.msk.bf16.mxu1 %vm671_vm4, %v1543_v38  ;;  %v1542_v40 = vadd.f32 %v2487_v35, %v1533_v39 }
 0xc90   : > { %v1544_v41 = vpack.c.bf16 %v1542_v40, %v1542_v40 }
 0xc92   : > { %2716 = vmatmul.mubr.msk.bf16.vlgmr.msra.gmra.mrb[20].mxu1 %vm671_vm4, %v1544_v41 }
 0xd65   : > { %v2717_v43 = vpop.f32.mrb[20].mxu1 }
 0xd66   : > { %v1619_v44 = vadd.f32 %v2717_v43, %v2493_v42  ;;  %v1610_v45 = vpop.f32.mrb[21].mxu1  ;;  %v2835_v43 = vld [vmem:[%s3401_s9 + $0x10] sm:$0xff]  }
 0xd67   : > { %v2718_v46 = vpop.f32.mrb[22].mxu1  ;;  %v1611_v49 = vadd.f32 %v2493_v42, %v1610_v45 }
 0xd68   : > { %v3256_v47 = vpack.c.bf16 %v1619_v44, %v1619_v44  ;;  %v1613_v48 = vpop.f32.mrb[23].mxu1 }
 0xd69   : > { %v1614_v50 = vadd.f32 %v2493_v42, %v1613_v48 }
 0xd6a   : > { %1635 = vrot.lane.b32.xlu1 %v3256_v47, %s2915_s30 }
 0xd6b   : > { %v3260_v51 = vpack.c.bf16 %v1614_v50, %v1611_v49 }
 0xd6d   : > { %1633 = vrot.lane.b32.xlu0 %v3260_v51, %s2915_s30  ;;  %2723 = vmatprep.mubr.msk.bf16.mxu1 %vm839_vm5, %v3260_v51  ;;  %s3422_s30 = smov 80  }
 0xddc   : > { %v1636_v55 = vpop.permute.xlu1 %1635 }
 0xddd   : > { %v1647_v12 = vsel %vm839_vm5, %v1636_v55, 0 }
 0xddf   : > { %v1634_v52 = vpop.permute.xlu0 %1633 }
 0xde0   : > { %v1644_v53 = vsel %vm839_vm5, %v1634_v52, 0  ;;  %2797 = vmatprep.subr.msk.bf16.mxu1 %vm839_vm5, %v1634_v52 }
 0xde1   : > { %2720 = vmatpush3.bf16.xpose.msra.mxu1 %v1644_v53 }
 0xde2   : > { %2798 = vmatprep.subr.msk.bf16.mxu1 %vm839_vm5, %v1636_v55 }
 0xde9   : > { %2722 = vmatpush3.bf16.xpose.msra.mxu1 %v1647_v12 }
 0xdf0   : > { %2724 = vmatmul.mubr.msk.bf16.vlgmr.msra.gmra.mrb[24].mxu1 %vm839_vm5, %v3256_v47 }
 0xec3   : > { %v2725_v57 = vpop.f32.mrb[24].mxu1 }
 0xec4   : > { %v1683_v58 = vpop.f32.mrb[25].mxu1  ;;  %v1692_v0 = vadd.f32 %v2725_v57, %v3127_v26 }
 0xec5   : > { %v1684_v59 = vadd.f32 %v1683_v58, %v3127_v26  ;;  %v2726_v60 = vpop.f32.mrb[26].mxu1 }
 0xec6   : > { %v1686_v61 = vpop.f32.mrb[27].mxu1  ;;  %v1703_v3 = vsel %vm900_vm7, %v1692_v0, -inf }
 0xec7   : > { %v1687_v62 = vadd.f32 %v1686_v61, %v3127_v26  ;;  %v1697_v63 = vsel %vm900_vm7, %v1684_v59, -inf }
 0xec8   : > { %1698 = vmax.xlane.f32.xlu1 %v1697_v63 }
 0xec9   : > { %v1700_v2 = vsel %vm900_vm7, %v1687_v62, -inf }
 0xeca   : > { %1701 = vmax.xlane.f32.xlu0 %v1700_v2 }
 0xece   : > { %1704 = vmax.xlane.f32.xlu0 %v1703_v3 }
 0xf55   : > { %v1699_v4 = vpop.xlane.xlu1 %1698 }
 0xf56   : > { %v1706_v7 = vsub.f32 %v1684_v59, %v1699_v4 }
 0xf57   : > { %v1702_v5 = vpop.xlane.xlu0 %1701 }
 0xf58   : > { %v1707_v6 = vsub.f32 %v1687_v62, %v1702_v5  ;;  %v1709_v13 = vmul.f32 1.442695, %v1706_v7 }
 0xf5a   : > { %v1711_v8 = vmul.f32 1.442695, %v1707_v6 }
 0xf5b   : > { %v1705_v9 = vpop.xlane.xlu0 %1704 }
 0xf5c   : > { %2881 = vpow2.f32 %v1711_v8  ;;  %v1708_v11 = vsub.f32 %v1692_v0, %v1705_v9 }
 0xf5e   : > { %v1713_v14 = vmul.f32 1.442695, %v1708_v11 }
 0xf60   : > { %2883 = vpow2.f32 %v1713_v14 }
 0xf61   : > { %2885 = vpow2.f32 %v1709_v13 }
 0xf66   : > { %v2882_v15 = vpop.eup %2881 }
 0xf67   : > { %v1718_v17 = vsel %vm900_vm7, %v2882_v15, 0.0 }
 0xf68   : > { %1719 = vadd.xlane.f32.xlu0 %v1718_v17 }
 0xf6a   : > { %v2884_v18 = vpop.eup %2883 }
 0xf6b   : > { %v1721_v19 = vsel %vm900_vm7, %v2884_v18, 0.0  ;;  %v2886_v20 = vpop.eup %2885 }
 0xf6c   : > { %1722 = vadd.xlane.f32.xlu1 %v1721_v19  ;;  %v1715_v22 = vsel %vm900_vm7, %v2886_v20, 0.0 }
 0xf70   : > { %1716 = vadd.xlane.f32.xlu1 %v1715_v22 }
 0xf7e   : > { %1732 = vrot.lane.b32.xlu0 %v3260_v51, %s2917_s19 }
 0xf81   : > { %1734 = vrot.lane.b32.xlu1 %v3256_v47, %s2917_s19 }
 0xf82   : > { %1796 = vrot.lane.b32.xlu0 %v3260_v51, %s2918_s1 }
 0xf85   : > { %1800 = vrot.lane.b32.xlu1 %v3260_v51, %s3422_s30 }
 0xf89   : > { %1802 = vrot.lane.b32.xlu1 %v3256_v47, %s3422_s30  ;;  %s586_s30 = scalar_lea.vmem %s3410_s18, %s2444_s29 }
 0xf8d   : > { %1798 = vrot.lane.b32.xlu1 %v3256_v47, %s2918_s1 }
 0xff5   : > { %v1720_v24 = vpop.xlane.xlu0 %1719 }
 0xff9   : > { %v1733_v27 = vpop.permute.xlu0 %1732  ;;  %v1723_v28 = vpop.xlane.xlu1 %1722 }
 0xffa   : > { %2727 = vmatprep.subr.bf16.mxu0 %v1733_v27  ;;  %2887 = vrcp.f32 %v1723_v28 }
 0xffb   : > { %2728 = vmatpush3.bf16.msra.mxu0 %v1733_v27  ;;  %2889 = vrcp.f32 %v1720_v24 }
 0xffd   : > { %v1717_v29 = vpop.xlane.xlu1 %1716  ;;  %v1797_v38 = vpop.permute.xlu0 %1796 }
 0xffe   : > { %2891 = vrcp.f32 %v1717_v29 }
0x1001   : > { %v1735_v30 = vpop.permute.xlu1 %1734 }
0x1002   : > { %v1744_v31 = vsel %vm947_vm8, %v1735_v30, 0  ;;  %2799 = vmatprep.subr.msk.bf16.mxu0 %vm947_vm8, %v1735_v30 }
0x1003   : > { %2730 = vmatpush3.bf16.msra.mxu0 %v1744_v31 }
0x1004   : > { %v2888_v32 = vpop.eup %2887 }
0x1005   : > { %v1801_v33 = vpop.permute.xlu1 %1800  ;;  %v2890_v34 = vpop.eup %2889  ;;  %v1729_v10 = vmul.f32 %v2888_v32, %v2884_v18 }
0x1006   : > { %2800 = vmatprep.subr.msk.bf16.mxu0 %vm839_vm5, %v1801_v33  ;;  %v1728_v25 = vmul.f32 %v2890_v34, %v2882_v15  ;;  %v1811_v39 = vsel %vm839_vm5, %v1801_v33, 0 }
0x1007   : > { %v1731_v37 = vpack.c.bf16 %v1729_v10, %v1729_v10 }
0x1008   : > { %v2892_v35 = vpop.eup %2891 }
0x1009   : > { %v1727_v23 = vmul.f32 %v2892_v35, %v2886_v20  ;;  %v1803_v40 = vpop.permute.xlu1 %1802 }
0x100a   : > { %v1814_v41 = vsel %vm839_vm5, %v1803_v40, 0 }
0x100b   : > { %v1730_v36 = vpack.c.bf16 %v1728_v25, %v1727_v23 }
0x100d   : > { %2731 = vmatprep.mubr.msk.bf16.mxu0 %vm900_vm7, %v1730_v36  ;;  %v1799_v42 = vpop.permute.xlu1 %1798 }
0x100e   : > { %2732 = vmatmul.mubr.msk.bf16.vlgmr.msra.gmra.mrb[20].mxu0 %vm900_vm7, %v1731_v37 }
0x100f   : > { %2736 = vmatpush3.bf16.xpose.msra.mxu0 %v1811_v39  ;;  %2739 = vmatprep.mubr.msk.bf16.mxu0 %vm839_vm5, %v1797_v38 }
0x1010   : > { %2801 = vmatprep.subr.msk.bf16.mxu0 %vm839_vm5, %v1803_v40 }
0x1017   : > { %2738 = vmatpush3.bf16.xpose.msra.mxu0 %v1814_v41  ;;  %v2837_v41 = vld [vmem:[%s3403_s11 + $0x10] sm:$0xff]  }
0x1018   : > { %2757 = vmatprep.subr.bf16.mxu0 %v2835_v43 }
0x101e   : > { %2740 = vmatmul.mubr.msk.bf16.vlgmr.msra.gmra.mrb[24].mxu0 %vm839_vm5, %v1799_v42  ;;  %v2838_v42 = vld [vmem:[%s3403_s11 + $0x18] sm:$0xff]  }
0x101f   : > { %2758 = vmatpush3.bf16.msra.mxu0 %v2835_v43  ;;  %v2839_v43 = vld [vmem:[%s3405_s13 + $0x20] sm:$0xff]  }
0x1020   : > { %2771 = vmatprep.subr.bf16.mxu0 %v2839_v43 }
0x10e1   : > { %v2733_v44 = vpop.f32.mrb[20].mxu0 }
0x10e2   : > { %v1780_v45 = vpop.f32.mrb[21].mxu0  ;;  %v1795_v50 = vpack.c.bf16 %v2733_v44, %v2733_v44  ;;  %v2840_v44 = vld [vmem:[%s3405_s13 + $0x28] sm:$0xff]  }
0x10e3   : > { %v2734_v46 = vpop.f32.mrb[22].mxu0 }
0x10e4   : > { %v1783_v48 = vpop.f32.mrb[23].mxu0  ;;  %v2517_v46 = vld [vmem:[%s3402_s10 + $0x1] ss:$0 sm:$0xff] }
0x10e5   : > { %v1794_v49 = vpack.c.bf16 %v1783_v48, %v1780_v45 }
0x10e7   : > { %2759 = vmatprep.mubr.msk.bf16.mxu0 %vm839_vm5, %v1794_v49 }
0x10e8   : > { %2760 = vmatmul.mubr.msk.bf16.vlgmr.msra.gmra.mrb[28].mxu0 %vm839_vm5, %v1795_v50 }
0x10e9   : > { %2772 = vmatpush3.bf16.msra.mxu0 %v2839_v43 }
0x10ea   : > { %2773 = vmatprep.subr.bf16.mxu0 %v2840_v44 }
0x10ed   : > { %2774 = vmatpush3.bf16.msra.mxu0 %v2840_v44 }
0x10f1   : > { %v2741_v52 = vpop.f32.mrb[24].mxu0 }
0x10f2   : > { %v1850_v53 = vpop.f32.mrb[25].mxu0  ;;  %v1859_v58 = vadd.f32 %v2741_v52, %v3127_v26 }
0x10f3   : > { %v1851_v55 = vadd.f32 %v1850_v53, %v3127_v26  ;;  %v2742_v12 = vpop.f32.mrb[26].mxu0 }
0x10f4   : > { %v1853_v57 = vpop.f32.mrb[27].mxu0  ;;  %v1870_v62 = vsel %vm900_vm7, %v1859_v58, -inf }
0x10f5   : > { %v1854_v59 = vadd.f32 %v1853_v57, %v3127_v26  ;;  %v1864_v60 = vsel %vm900_vm7, %v1851_v55, -inf }
0x10f6   : > { %1865 = vmax.xlane.f32.xlu0 %v1864_v60 }
0x10f7   : > { %v1867_v61 = vsel %vm900_vm7, %v1854_v59, -inf }
0x10f8   : > { %1868 = vmax.xlane.f32.xlu1 %v1867_v61 }
0x10fa   : > { %1871 = vmax.xlane.f32.xlu0 %v1870_v62 }
0x1183   : > { %v1866_v63 = vpop.xlane.xlu0 %1865 }
0x1184   : > { %v1873_v0 = vsub.f32 %v1851_v55, %v1866_v63 }
0x1185   : > { %v1869_v2 = vpop.xlane.xlu1 %1868 }
0x1186   : > { %v1876_v3 = vmul.f32 1.442695, %v1873_v0  ;;  %v1874_v4 = vsub.f32 %v1854_v59, %v1869_v2  ;;  %v2841_v0 = vld [vmem:[%s3405_s13 + $0x30] sm:$0xff]  }
0x1187   : > { %v1872_v5 = vpop.xlane.xlu0 %1871  ;;  %2775 = vmatprep.subr.bf16.mxu0 %v2841_v0 }
0x1188   : > { %2893 = vpow2.f32 %v1876_v3  ;;  %v1878_v6 = vmul.f32 1.442695, %v1874_v4  ;;  %v1875_v7 = vsub.f32 %v1859_v58, %v1872_v5  ;;  %2776 = vmatpush3.bf16.msra.mxu0 %v2841_v0 }
0x118a   : > { %2895 = vpow2.f32 %v1878_v6  ;;  %v1880_v26 = vmul.f32 1.442695, %v1875_v7 }
0x118c   : > { %2897 = vpow2.f32 %v1880_v26 }
0x1192   : > { %v2894_v8 = vpop.eup %2893 }
0x1193   : > { %v1882_v9 = vsel %vm900_vm7, %v2894_v8, 0.0 }
0x1194   : > { %v2896_v11 = vpop.eup %2895  ;;  %1883 = vadd.xlane.f32.xlu0 %v1882_v9 }
0x1195   : > { %v1885_v14 = vsel %vm900_vm7, %v2896_v11, 0.0 }
0x1196   : > { %v2898_v13 = vpop.eup %2897 }
0x1197   : > { %v1888_v15 = vsel %vm900_vm7, %v2898_v13, 0.0 }
0x1198   : > { %1886 = vadd.xlane.f32.xlu0 %v1885_v14  ;;  %1889 = vadd.xlane.f32.xlu1 %v1888_v15  ;;  %v2843_v14 = vld [vmem:[%s3407_s15] sm:$0xff]   ;;  %v2844_v15 = vld [vmem:[%s3407_s15 + $0x8] sm:$0xff]  }
0x11a9   : > { %1901 = vrot.lane.b32.xlu1 %v3256_v47, %s3423_s21  ;;  %v2836_v47 = vld [vmem:[%s3401_s9 + $0x18] sm:$0xff]  }
0x11ae   : > { %1899 = vrot.lane.b32.xlu0 %v3260_v51, %s3423_s21 }
0x11bb   : > { %v2761_v17 = vpop.f32.mrb[28].mxu0 }
0x11bc   : > { %v2069_v18 = vpop.f32.mrb[29].mxu0 }
0x11bd   : > { %v2762_v19 = vpop.f32.mrb[30].mxu0 }
0x11be   : > { %v2072_v20 = vpop.f32.mrb[31].mxu0 }
0x1221   : > { %v1884_v22 = vpop.xlane.xlu0 %1883 }
0x1222   : > { %2899 = vrcp.f32 %v1884_v22 }
0x1225   : > { %v1890_v24 = vpop.xlane.xlu1 %1889  ;;  %v1887_v27 = vpop.xlane.xlu0 %1886 }
0x1226   : > { %2901 = vrcp.f32 %v1890_v24 }
0x1227   : > { %2903 = vrcp.f32 %v1887_v27 }
0x1229   : > { %v1900_v28 = vpop.permute.xlu0 %1899  ;;  %v1902_v29 = vpop.permute.xlu1 %1901 }
0x122a   : > { %2743 = vmatprep.subr.bf16.mxu1 %v1900_v28  ;;  %v1911_v51 = vsel %vm947_vm8, %v1902_v29, 0 }
0x122b   : > { %2744 = vmatpush3.bf16.msra.mxu1 %v1900_v28 }
0x122c   : > { %2802 = vmatprep.subr.msk.bf16.mxu1 %vm947_vm8, %v1902_v29  ;;  %v2900_v30 = vpop.eup %2899 }
0x122d   : > { %v1894_v34 = vmul.f32 %v2900_v30, %v2894_v8  ;;  %v2346_v30 = vshrl.u32 %v684_v21, 7 }
0x122f   : > { %2746 = vmatpush3.bf16.msra.mxu1 %v1911_v51 }
0x1230   : > { %v2902_v31 = vpop.eup %2901  ;;  %2751 = vmatprep.subr.bf16.mxu1 %v2836_v47 }
0x1231   : > { %v2904_v32 = vpop.eup %2903  ;;  %v1896_v33 = vmul.f32 %v2902_v31, %v2898_v13  ;;  %v2289_v31 = vld [vmem:[%s3408_s16] sm:$0x1] }
0x1232   : > { %v1895_v35 = vmul.f32 %v2904_v32, %v2896_v11  ;;  %v2347_v32 = vsub.s32 0, %v2346_v30 }
0x1233   : > { %v1898_v10 = vpack.c.bf16 %v1896_v33, %v1896_v33 }
0x1234   : > { %v1897_v23 = vpack.c.bf16 %v1895_v35, %v1894_v34 }
0x1236   : > { %2747 = vmatprep.mubr.msk.bf16.mxu1 %vm900_vm7, %v1897_v23 }
0x1237   : > { %2748 = vmatmul.mubr.msk.bf16.vlgmr.msra.gmra.mrb[28].mxu1 %vm900_vm7, %v1898_v10 }
0x1238   : > { %2752 = vmatpush3.bf16.msra.mxu1 %v2836_v47 }
0x1239   : > { %2763 = vmatprep.subr.bf16.mxu1 %v2837_v41 }
0x130a   : > { %v2749_v25 = vpop.f32.mrb[28].mxu1 }
0x130b   : > { %v1947_v36 = vpop.f32.mrb[29].mxu1  ;;  %v1962_v40 = vpack.c.bf16 %v2749_v25, %v2749_v25 }
0x130c   : > { %v2750_v37 = vpop.f32.mrb[30].mxu1 }
0x130d   : > { %v1950_v38 = vpop.f32.mrb[31].mxu1 }
0x130e   : > { %v1961_v39 = vpack.c.bf16 %v1950_v38, %v1947_v36 }
0x1310   : > { %2753 = vmatprep.mubr.msk.bf16.mxu1 %vm839_vm5, %v1961_v39 }
0x1311   : > { %2754 = vmatmul.mubr.msk.bf16.vlgmr.msra.gmra.mrb[32].mxu1 %vm839_vm5, %v1962_v40 }
0x1312   : > { %2764 = vmatpush3.bf16.msra.mxu1 %v2837_v41 }
0x1313   : > { %2765 = vmatprep.subr.bf16.mxu1 %v2838_v42 }
0x1316   : > { %2766 = vmatpush3.bf16.msra.mxu1 %v2838_v42 }
0x1317   : > { %2783 = vmatprep.subr.bf16.mxu1 %v2913_v1 }
0x13e4   : > { %v2755_v45 = vpop.f32.mrb[32].mxu1 }
0x13e5   : > { %v2078_v48 = vadd.f32 %v2761_v17, %v2755_v45  ;;  %v2009_v49 = vpop.f32.mrb[33].mxu1  ;;  %v2537_v17 = vld [vmem:[%s3406_s14 + $0x1] ss:$0 sm:$0xff] }
0x13e6   : > { %v2070_v50 = vadd.f32 %v2069_v18, %v2009_v49  ;;  %v2756_v52 = vpop.f32.mrb[34].mxu1 }
0x13e7   : > { %v2093_v53 = vadd.f32 %v2517_v46, %v2078_v48  ;;  %v2012_v55 = vpop.f32.mrb[35].mxu1 }
0x13e8   : > { %v2091_v12 = vadd.f32 %v2517_v46, %v2070_v50  ;;  %v2073_v57 = vadd.f32 %v2072_v20, %v2012_v55 }
0x13e9   : > { %v2096_v59 = vadd.f32 %v2093_v53, %v3227_v16 }
0x13ea   : > { %v2092_v58 = vadd.f32 %v2517_v46, %v2073_v57  ;;  %v2094_v60 = vadd.f32 %v2091_v12, %v3221_v54  ;;  %v2842_v54 = vld [vmem:[%s3405_s13 + $0x38] sm:$0xff]  }
0x13eb   : > { %v2098_v63 = vpack.c.bf16 %v2096_v59, %v2096_v59  ;;  %2777 = vmatprep.subr.bf16.mxu0 %v2842_v54 }
0x13ec   : > { %v2095_v61 = vadd.f32 %v2092_v58, %v3223_v56  ;;  %2778 = vmatpush3.bf16.msra.mxu0 %v2842_v54  ;;  %v2523_v56 = vld [vmem:[%s3404_s12 + $0x1] ss:$0 sm:$0xff] }
0x13ee   : > { %v2097_v62 = vpack.c.bf16 %v2095_v61, %v2094_v60 }
0x13f0   : > { %2767 = vmatprep.mubr.msk.bf16.mxu1 %vm671_vm4, %v2097_v62 }
0x13f1   : > { %2768 = vmatmul.mubr.msk.bf16.vlgmr.msra.gmra.mrb[36].mxu1 %vm671_vm4, %v2098_v63 }
0x13f2   : > { %2787 = vmatprep.mubr.msk.bf16.mxu1 %vm2914_vm0, %v2913_v1  ;;  %2784 = vmatpush3.bf16.msra.mxu1 %v2843_v14 }
0x13f3   : > { %2785 = vmatprep.subr.bf16.mxu1 %v2913_v1 }
0x13f6   : > { %2786 = vmatpush3.bf16.msra.mxu1 %v2844_v15 }
0x14c4   : > { %v2769_v16 = vpop.f32.mrb[36].mxu1 }
0x14c5   : > { %v2173_v2 = vadd.f32 %v2769_v16, %v2523_v56  ;;  %v2164_v3 = vpop.f32.mrb[37].mxu1 }
0x14c6   : > { %v2165_v4 = vadd.f32 %v2523_v56, %v2164_v3  ;;  %v2770_v5 = vpop.f32.mrb[38].mxu1 }
0x14c7   : > { %v2167_v6 = vpop.f32.mrb[39].mxu1  ;;  %v2180_v26 = vmax.f32 %v2173_v2, 0.0 }
0x14c8   : > { %v2168_v7 = vadd.f32 %v2523_v56, %v2167_v6  ;;  %v2178_v8 = vmax.f32 %v2165_v4, 0.0 }
0x14c9   : > { %v2182_v13 = vpack.c.bf16 %v2180_v26, %v2180_v26 }
0x14ca   : > { %v2179_v9 = vmax.f32 %v2168_v7, 0.0 }
0x14cc   : > { %v2181_v11 = vpack.c.bf16 %v2179_v9, %v2178_v8 }
0x14ce   : > { %2779 = vmatprep.mubr.msk.bf16.mxu0 %vm1424_vm9, %v2181_v11 }
0x14cf   : > { %2780 = vmatmul.mubr.msk.bf16.vlgmr.msra.gmra.mrb[32].mxu0 %vm1424_vm9, %v2182_v13 }
0x15a2   : > { %v2781_v18 = vpop.f32.mrb[32].mxu0 }
0x15a3   : > { %v2273_v19 = vadd.f32 %v2781_v18, %v2537_v17  ;;  %v2264_v20 = vpop.f32.mrb[33].mxu0 }
0x15a4   : > { %v2265_v22 = vadd.f32 %v2537_v17, %v2264_v20  ;;  %v2782_v24 = vpop.f32.mrb[34].mxu0 }
0x15a5   : > { %v2280_v27 = vadd.f32 %v2273_v19, %v2096_v59  ;;  %v2267_v28 = vpop.f32.mrb[35].mxu0 }
0x15a6   : > { %v2278_v29 = vadd.f32 %v2265_v22, %v2094_v60  ;;  %v2268_v1 = vadd.f32 %v2537_v17, %v2267_v28 }
0x15a7   : > { %2283 = vst.msk [vmem:[%s3054_s22 + $0x10] sm:$0xff] %vm671_vm4, %v2280_v27 }
0x15a8   : > { %2281 = vst.msk [vmem:[%s3054_s22] sm:$0xff] %vm671_vm4, %v2278_v29  ;;  %v2284_v47 = vpack.c.bf16 %v2278_v29, %v2278_v29  ;;  %v2279_v51 = vadd.f32 %v2268_v1, %v2095_v61 }
0x15aa   : > { %2282 = vst.msk [vmem:[%s3054_s22 + $0x8] sm:$0xff] %vm671_vm4, %v2279_v51  ;;  %2788 = vmatmul.mubr.msk.bf16.vlgmr.msra.gmra.mrb[40].mxu1 %vm671_vm4, %v2284_v47 }
0x167d   : > { %v2339_v33 = vpop.f32.mrb[40].mxu1 }
0x167e   : > { %v2340_v34 = vadd.f32 %v2339_v33, %v2289_v31  ;;  %v2789_v35 = vpop.f32.mrb[41].mxu1 }
0x167f   : > { %v2342_v10 = vpop.f32.mrb[42].mxu1 }
0x1680   : > { %v2348_v23 = vrot.slane %v2340_v34, %v2347_v32  ;;  %v2790_v25 = vpop.f32.mrb[43].mxu1 }
0x1682   : > { %2349 = vst [vmem:[%s586_s30] sm:$0xff] %v2348_v23 }
0x1683 PF: > { %s29_s27 = sadd.s32 1, %s2911_s27  }
0x1684   : > { %p26_p4 = scmp.ge.s32.totalorder %s29_s27, 4  }
0x1686   :  { %28 = sbr.rel (!%p26_p4) target bundleno = 4 (0x4), region = 140 }

</bundles_post_ra>
